<compile_context>
chip_gen: v7x
topology: tpu7x:2x2x1
jax: 0.10.0
libtpu: 0.0.40
codegen_flags: <defaults>
</compile_context>

<pallas_src>
import numpy as np
import jax
import jax.numpy as jnp
from jax.experimental import pallas as pl
from jax.experimental.pallas import tpu as pltpu


# -----------------------------------------------------------------------------
# Bilinear interpolation weights (PyTorch F.interpolate, align_corners=False)
# -----------------------------------------------------------------------------
def _bilinear_axis_matrix(out_size, in_size):
    scale = in_size / out_size
    i = np.arange(out_size, dtype=np.float64)
    src = np.maximum((i + 0.5) * scale - 0.5, 0.0)
    i0 = np.minimum(np.floor(src).astype(np.int64), in_size - 1)
    i1 = np.minimum(i0 + 1, in_size - 1)
    w1 = np.clip(src - i0, 0.0, 1.0)
    w0 = 1.0 - w1
    R = np.zeros((out_size, in_size), dtype=np.float64)
    rows = np.arange(out_size)
    np.add.at(R, (rows, i0), w0)
    np.add.at(R, (rows, i1), w1)
    return R


def _bilinear_matrix_2d(out_hw, in_hw):
    # Dense kron operator -- used only by the pure-JAX reference.
    Rh = _bilinear_axis_matrix(out_hw[0], in_hw[0])
    Rw = _bilinear_axis_matrix(out_hw[1], in_hw[1])
    return np.kron(Rh, Rw).astype(np.float32)


# -----------------------------------------------------------------------------
# Pallas kernel: one batch element per grid step.
# Layouts inside the kernel (per element):
#   x  : (Hh, 4*Cx, Wh)  space-to-depth, channel index = tap*Cx + c, W on lanes
#   g  : (Hg, Cg, Wg)
#   z  : (Hh, 4*Cx, Wh)  pre-BatchNorm output in the same s2d layout
# -----------------------------------------------------------------------------
def _attn_kernel(x_ref, g_ref, wth_ref, wphi_ref, bphi_ref, wpsi_ref, bpsi_ref,
                 ww_ref, bw_ref, rh1_ref, rw1t_ref, rh2_ref, rw2t_ref,
                 z_ref, mean_ref, m2_ref):
    f32 = jnp.float32
    _, Hh, C4, Wh = x_ref.shape
    Cx = C4 // 4
    _, Hg, Cg, Wg = g_ref.shape

    xs = x_ref[0]                       # (Hh, 4*Cx, Wh)
    gs = g_ref[0]                       # (Hg, Cg, Wg)

    # --- theta: 2x2 / stride-2 conv == ONE batched matmul over the Hh rows ----
    wth = jnp.broadcast_to(wth_ref[...][None], (Hh, Cx, 4 * Cx))
    theta = jnp.einsum('idk,ikw->idw', wth, xs,
                       preferred_element_type=f32)                 # (Hh, Cx, Wh)

    # --- phi: 1x1 conv on g, then SEPARABLE bilinear resize to (Hh, Wh) -------
    wphi = jnp.broadcast_to(wphi_ref[...][None], (Hg, Cx, Cg))
    phi = jnp.einsum('adc,acw->adw', wphi, gs,
                     preferred_element_type=f32) + bphi_ref[...]   # (Hg, Cx, Wg)
    rw1 = jnp.broadcast_to(rw1t_ref[...][None], (Hg, Wg, Wh))
    phi_w = jnp.einsum('acb,abj->acj', phi, rw1,
                       preferred_element_type=f32)                 # (Hg, Cx, Wh)
    # H-axis blend: Hg (coarse gating rows) is small -> cheap unrolled VPU sum.
    rh1 = rh1_ref[...]                                             # (Hh, Hg)
    phi_up = rh1[:, 0:1][:, :, None] * phi_w[0][None, :, :]
    for a in range(1, Hg):
        phi_up = phi_up + rh1[:, a:a + 1][:, :, None] * phi_w[a][None, :, :]

    # --- f = relu(theta + phi); psi gate as VPU multiply + channel reduce -----
    f = jnp.maximum(theta + phi_up, 0.0)                           # (Hh, Cx, Wh)
    s = jax.nn.sigmoid(jnp.sum(f * wpsi_ref[...], axis=1) + bpsi_ref[...])  # (Hh, Wh)

    # --- per s2d tap: separable gate upsample, gate*(Conv_W x), BN statistics -
    ww = jnp.broadcast_to(ww_ref[...][None], (Hh, Cx, Cx))
    z_taps = []
    total = None
    for t in range(4):
        di, dj = t // 2, t % 2
        # s_up restricted to this tap's pixels: Rh2[di::2] @ s @ Rw2[dj::2].T
        su = jnp.dot(rh2_ref[di], s, preferred_element_type=f32)   # (Hh, Wh)
        su = jnp.dot(su, rw2t_ref[dj], preferred_element_type=f32)  # (Hh, Wh)
        x_t = xs[:, t * Cx:(t + 1) * Cx, :]                        # (Hh, Cx, Wh)
        # gate and 1x1 conv commute: Conv_W(s_up*x) = s_up*(Ww@x) + b_w
        xw = jnp.einsum('idc,icw->idw', ww, x_t, preferred_element_type=f32)
        z_t = su[:, None, :] * xw + bw_ref[...]                    # (Hh, Cx, Wh)
        z_ref[0, :, t * Cx:(t + 1) * Cx, :] = z_t
        z_taps.append(z_t)
        part = jnp.sum(jnp.sum(z_t, axis=2, keepdims=True), axis=0, keepdims=True)
        total = part if total is None else total + part            # (1, Cx, 1)

    n_pix = 4.0 * Hh * Wh
    mean = total / n_pix                                           # (1, Cx, 1)
    m2 = None
    for z_t in z_taps:                                             # centred 2nd moment
        d = z_t - mean
        part = jnp.sum(jnp.sum(d * d, axis=2, keepdims=True), axis=0, keepdims=True)
        m2 = part if m2 is None else m2 + part
    mean_ref[0] = mean
    m2_ref[0] = m2


# -----------------------------------------------------------------------------
# Wrapper
# -----------------------------------------------------------------------------
def add_attn_forward(x, g, params, *, compute_dtype=jnp.float32):
    f32 = jnp.float32
    B, Cx, H, W = x.shape
    Bg, Cg, Hg, Wg = g.shape
    assert B == Bg and H % 2 == 0 and W % 2 == 0
    Hh, Wh = H // 2, W // 2

    # ---- layout plumbing: one XLA rearrange of x into space-to-depth ---------
    x_s2d = (x.astype(compute_dtype)
              .reshape(B, Cx, Hh, 2, Wh, 2)
              .transpose(0, 2, 3, 5, 1, 4)            # (b, i, di, dj, c, j)
              .reshape(B, Hh, 4 * Cx, Wh))
    g_t = g.astype(compute_dtype).transpose(0, 2, 1, 3)    # (B, Hg, Cg, Wg)

    # ---- weights in matmul form ----------------------------------------------
    wth4 = (params['theta_w'].astype(compute_dtype)
            .transpose(0, 2, 3, 1).reshape(Cx, 4 * Cx))    # [d, tap*Cx + c]
    wphi = params['phi_w'][:, :, 0, 0].astype(compute_dtype)      # (Cx, Cg)
    bphi = params['phi_b'].astype(f32).reshape(1, Cx, 1)
    wpsi = params['psi_w'][0, :, 0, 0].astype(f32).reshape(1, Cx, 1)
    bpsi = params['psi_b'].astype(f32).reshape(1, 1)
    ww = params['W_w'][:, :, 0, 0].astype(compute_dtype)          # (Cx, Cx)
    bw = params['W_b'].astype(f32).reshape(1, Cx, 1)

    # ---- separable bilinear constants (per-axis, O(H*Hh + W*Wh) bytes) -------
    rh1 = jnp.asarray(_bilinear_axis_matrix(Hh, Hg), f32)              # (Hh, Hg)
    rw1t = jnp.asarray(_bilinear_axis_matrix(Wh, Wg).T, f32)           # (Wg, Wh)
    Rh2 = _bilinear_axis_matrix(H, Hh)                                 # (H, Hh)
    Rw2 = _bilinear_axis_matrix(W, Wh)                                 # (W, Wh)
    rh2 = jnp.asarray(np.stack([Rh2[0::2, :], Rh2[1::2, :]]), f32)     # (2, Hh, Hh)
    rw2t = jnp.asarray(np.stack([Rw2[0::2, :].T, Rw2[1::2, :].T]), f32)  # (2, Wh, Wh)

    inputs = (x_s2d, g_t, wth4, wphi, bphi, wpsi, bpsi, ww, bw,
              rh1, rw1t, rh2, rw2t)

    def batch_spec(shape):
        nd = len(shape)
        return pl.BlockSpec((1,) + tuple(shape[1:]),
                            lambda b, _n=nd: (b,) + (0,) * (_n - 1))

    def const_spec(shape):
        nd = len(shape)
        return pl.BlockSpec(tuple(shape), lambda b, _n=nd: (0,) * _n)

    in_specs = [batch_spec(x_s2d.shape), batch_spec(g_t.shape)]
    in_specs += [const_spec(a.shape) for a in inputs[2:]]

    out_shapes = (
        jax.ShapeDtypeStruct((B, Hh, 4 * Cx, Wh), f32),   # z (pre-BN), s2d layout
        jax.ShapeDtypeStruct((B, 1, Cx, 1), f32),         # per-element channel mean
        jax.ShapeDtypeStruct((B, 1, Cx, 1), f32),         # per-element centred M2
    )
    out_specs = (batch_spec(out_shapes[0].shape),
                 batch_spec(out_shapes[1].shape),
                 batch_spec(out_shapes[2].shape))

    z_s2d, mean_b, m2_b = pl.pallas_call(
        _attn_kernel,
        out_shape=out_shapes,
        grid_spec=pltpu.PrefetchScalarGridSpec(
            num_scalar_prefetch=0, grid=(B,),
            in_specs=in_specs, out_specs=out_specs),
        compiler_params=pltpu.CompilerParams(
            dimension_semantics=("parallel",),
            vmem_limit_bytes=32 * 1024 * 1024),
    )(*inputs)

    # ---- BatchNorm2d batch statistics: stable parallel (Chan) combination ----
    n_pix = H * W
    mean_b = mean_b.reshape(B, Cx)
    m2_b = m2_b.reshape(B, Cx)
    g_mean = jnp.mean(mean_b, axis=0)
    m2_tot = jnp.sum(m2_b, axis=0) + n_pix * jnp.sum((mean_b - g_mean[None, :]) ** 2, axis=0)
    var = m2_tot / (B * n_pix)                      # biased, as BatchNorm uses
    inv_std = 1.0 / jnp.sqrt(var + 1e-5)
    scale = params['bn_gamma'].astype(f32) * inv_std
    shift = params['bn_beta'].astype(f32) - g_mean * scale

    # ---- BN affine + s2d -> NCHW restore: one fused XLA elementwise/transpose -
    scale4 = jnp.tile(scale, 4)
    shift4 = jnp.tile(shift, 4)
    out = z_s2d * scale4[None, None, :, None] + shift4[None, None, :, None]
    out = (out.reshape(B, Hh, 2, 2, Cx, Wh)
              .transpose(0, 4, 1, 2, 5, 3)
              .reshape(B, Cx, H, W))
    return out.astype(x.dtype)


# -----------------------------------------------------------------------------
# Pure-JAX reference (independent formulation: dense kron interpolation)
# -----------------------------------------------------------------------------
def add_attn_reference(x, g, params):
    f32 = jnp.float32
    B, Cx, H, W = x.shape
    _, Cg, Hg, Wg = g.shape
    Hh, Wh = H // 2, W // 2
    xf, gf = x.astype(f32), g.astype(f32)

    xp = xf.reshape(B, Cx, Hh, 2, Wh, 2)
    theta = jnp.einsum('bchiwj,dcij->bdhw', xp, params['theta_w'].astype(f32))
    phi = (jnp.einsum('bghw,dg->bdhw', gf, params['phi_w'][:, :, 0, 0].astype(f32))
           + params['phi_b'].astype(f32)[None, :, None, None])
    K1 = jnp.asarray(_bilinear_matrix_2d((Hh, Wh), (Hg, Wg)), f32)
    phi_up = jnp.einsum('pq,bdq->bdp', K1,
                        phi.reshape(B, Cx, Hg * Wg)).reshape(B, Cx, Hh, Wh)
    f = jax.nn.relu(theta + phi_up)
    s = jax.nn.sigmoid(jnp.einsum('bdhw,d->bhw', f, params['psi_w'][0, :, 0, 0].astype(f32))
                       + params['psi_b'].astype(f32)[0])
    K2 = jnp.asarray(_bilinear_matrix_2d((H, W), (Hh, Wh)), f32)
    s_up = jnp.einsum('pq,bq->bp', K2, s.reshape(B, Hh * Wh)).reshape(B, 1, H, W)
    y = s_up * xf
    z = (jnp.einsum('bchw,dc->bdhw', y, params['W_w'][:, :, 0, 0].astype(f32))
         + params['W_b'].astype(f32)[None, :, None, None])
    mean = jnp.mean(z, axis=(0, 2, 3), keepdims=True)
    var = jnp.mean((z - mean) ** 2, axis=(0, 2, 3), keepdims=True)
    out = ((z - mean) / jnp.sqrt(var + 1e-5)
           * params['bn_gamma'].astype(f32)[None, :, None, None]
           + params['bn_beta'].astype(f32)[None, :, None, None])
    return out.astype(x.dtype)


if __name__ == "__main__":
    key = jax.random.PRNGKey(0)
    B, Cx, H, W = 2, 4, 16, 16        # x: NCHW
    Cg, Hg, Wg = 8, 4, 4              # g: NCHW (small gating feature map)
    ks = jax.random.split(key, 12)

    x = jax.random.normal(ks[0], (B, Cx, H, W), jnp.float32)
    g = jax.random.normal(ks[1], (B, Cg, Hg, Wg), jnp.float32)

    params = {
        'theta_w': 0.2 * jax.random.normal(ks[2], (Cx, Cx, 2, 2), jnp.float32),
        'phi_w':   0.2 * jax.random.normal(ks[3], (Cx, Cg, 1, 1), jnp.float32),
        'phi_b':   0.1 * jax.random.normal(ks[4], (Cx,), jnp.float32),
        'psi_w':   0.2 * jax.random.normal(ks[5], (1, Cx, 1, 1), jnp.float32),
        'psi_b':   0.1 * jax.random.normal(ks[6], (1,), jnp.float32),
        'W_w':     0.2 * jax.random.normal(ks[7], (Cx, Cx, 1, 1), jnp.float32),
        'W_b':     0.1 * jax.random.normal(ks[8], (Cx,), jnp.float32),
        'bn_gamma': 1.0 + 0.1 * jax.random.normal(ks[9], (Cx,), jnp.float32),
        'bn_beta':  0.1 * jax.random.normal(ks[10], (Cx,), jnp.float32),
    }

    out = add_attn_forward(x, g, params)
    out = jax.block_until_ready(out)
    ref = add_attn_reference(x, g, params)

    assert out.shape == (B, Cx, H, W), out.shape
    max_err = float(jnp.max(jnp.abs(out - ref)))
    assert jnp.allclose(out, ref, atol=2e-4, rtol=2e-4), f"max_err={max_err}"
    print("KERNEL_OK")
</pallas_src>

<mosaic_0001>
module attributes {stable_mosaic.version = 11 : i64} {
  func.func @_attn_kernel(%arg0: i32, %arg1: memref<1x8x16x8xf32, #tpu.memory_space<vmem>>, %arg2: memref<1x4x8x4xf32, #tpu.memory_space<vmem>>, %arg3: memref<4x16xf32, #tpu.memory_space<vmem>>, %arg4: memref<4x8xf32, #tpu.memory_space<vmem>>, %arg5: memref<1x4x1xf32, #tpu.memory_space<vmem>>, %arg6: memref<1x4x1xf32, #tpu.memory_space<vmem>>, %arg7: memref<1x1xf32, #tpu.memory_space<vmem>>, %arg8: memref<4x4xf32, #tpu.memory_space<vmem>>, %arg9: memref<1x4x1xf32, #tpu.memory_space<vmem>>, %arg10: memref<8x4xf32, #tpu.memory_space<vmem>>, %arg11: memref<4x8xf32, #tpu.memory_space<vmem>>, %arg12: memref<2x8x8xf32, #tpu.memory_space<vmem>>, %arg13: memref<2x8x8xf32, #tpu.memory_space<vmem>>, %arg14: memref<1x8x16x8xf32, #tpu.memory_space<vmem>>, %arg15: memref<1x1x4x1xf32, #tpu.memory_space<vmem>>, %arg16: memref<1x1x4x1xf32, #tpu.memory_space<vmem>>) attributes {dimension_semantics = [#tpu.dimension_semantics<parallel>], iteration_bounds = array<i64: 2>, scalar_prefetch = 0 : i64, scratch_operands = 0 : i64, tpu.core_type = #tpu.core_type<tc>, window_params = [{transform_indices = @transform_0, window_bounds = array<i64: 1, 8, 16, 8>}, {transform_indices = @transform_1, window_bounds = array<i64: 1, 4, 8, 4>}, {pipeline_mode = #tpu.pipeline_mode<synchronous>, transform_indices = @transform_2, window_bounds = array<i64: 4, 16>}, {pipeline_mode = #tpu.pipeline_mode<synchronous>, transform_indices = @transform_3, window_bounds = array<i64: 4, 8>}, {pipeline_mode = #tpu.pipeline_mode<synchronous>, transform_indices = @transform_4, window_bounds = array<i64: 1, 4, 1>}, {pipeline_mode = #tpu.pipeline_mode<synchronous>, transform_indices = @transform_5, window_bounds = array<i64: 1, 4, 1>}, {pipeline_mode = #tpu.pipeline_mode<synchronous>, transform_indices = @transform_6, window_bounds = array<i64: 1, 1>}, {pipeline_mode = #tpu.pipeline_mode<synchronous>, transform_indices = @transform_7, window_bounds = array<i64: 4, 4>}, {pipeline_mode = #tpu.pipeline_mode<synchronous>, transform_indices = @transform_8, window_bounds = array<i64: 1, 4, 1>}, {pipeline_mode = #tpu.pipeline_mode<synchronous>, transform_indices = @transform_9, window_bounds = array<i64: 8, 4>}, {pipeline_mode = #tpu.pipeline_mode<synchronous>, transform_indices = @transform_10, window_bounds = array<i64: 4, 8>}, {pipeline_mode = #tpu.pipeline_mode<synchronous>, transform_indices = @transform_11, window_bounds = array<i64: 2, 8, 8>}, {pipeline_mode = #tpu.pipeline_mode<synchronous>, transform_indices = @transform_12, window_bounds = array<i64: 2, 8, 8>}, {transform_indices = @transform_13, window_bounds = array<i64: 1, 8, 16, 8>}, {transform_indices = @transform_14, window_bounds = array<i64: 1, 1, 4, 1>}, {transform_indices = @transform_15, window_bounds = array<i64: 1, 1, 4, 1>}]} {
    %c0 = arith.constant 0 : index
    %c0_0 = arith.constant 0 : index
    %c0_1 = arith.constant 0 : index
    %c0_2 = arith.constant 0 : index
    %0 = vector.load %arg1[%c0, %c0_0, %c0_1, %c0_2] : memref<1x8x16x8xf32, #tpu.memory_space<vmem>>, vector<1x8x16x8xf32>
    %1 = vector.shape_cast %0 : vector<1x8x16x8xf32> to vector<8x16x8xf32>
    %c0_3 = arith.constant 0 : index
    %c0_4 = arith.constant 0 : index
    %c0_5 = arith.constant 0 : index
    %c0_6 = arith.constant 0 : index
    %2 = vector.load %arg2[%c0_3, %c0_4, %c0_5, %c0_6] : memref<1x4x8x4xf32, #tpu.memory_space<vmem>>, vector<1x4x8x4xf32>
    %3 = vector.shape_cast %2 : vector<1x4x8x4xf32> to vector<4x8x4xf32>
    %c0_7 = arith.constant 0 : index
    %c0_8 = arith.constant 0 : index
    %4 = vector.load %arg3[%c0_7, %c0_8] : memref<4x16xf32, #tpu.memory_space<vmem>>, vector<4x16xf32>
    %5 = vector.shape_cast %4 : vector<4x16xf32> to vector<1x4x16xf32>
    %6 = vector.shape_cast %5 : vector<1x4x16xf32> to vector<1x4x16xf32>
    %7 = vector.broadcast %6 : vector<1x4x16xf32> to vector<8x4x16xf32>
    "tpu.trace_start"() <{level = 10 : i32, message = "idk,ikw->idw"}> : () -> ()
    %cst = arith.constant dense<0.000000e+00> : vector<8x4x8xf32>
    %8 = tpu.matmul %7, %1, %cst {dimension_numbers = #tpu.dot_dimension_numbers<[2], [1], [1], [2], [0, 0, 0, 1, 1, 2], [0], [0]>} : vector<8x4x16xf32>, vector<8x16x8xf32>, vector<8x4x8xf32> -> vector<8x4x8xf32>
    "tpu.trace_stop"() : () -> ()
    %c0_9 = arith.constant 0 : index
    %c0_10 = arith.constant 0 : index
    %9 = vector.load %arg4[%c0_9, %c0_10] : memref<4x8xf32, #tpu.memory_space<vmem>>, vector<4x8xf32>
    %10 = vector.shape_cast %9 : vector<4x8xf32> to vector<1x4x8xf32>
    %11 = vector.shape_cast %10 : vector<1x4x8xf32> to vector<1x4x8xf32>
    %12 = vector.broadcast %11 : vector<1x4x8xf32> to vector<4x4x8xf32>
    "tpu.trace_start"() <{level = 10 : i32, message = "adc,acw->adw"}> : () -> ()
    %cst_11 = arith.constant dense<0.000000e+00> : vector<4x4x4xf32>
    %13 = tpu.matmul %12, %3, %cst_11 {dimension_numbers = #tpu.dot_dimension_numbers<[2], [1], [1], [2], [0, 0, 0, 1, 1, 2], [0], [0]>} : vector<4x4x8xf32>, vector<4x8x4xf32>, vector<4x4x4xf32> -> vector<4x4x4xf32>
    "tpu.trace_stop"() : () -> ()
    %c0_12 = arith.constant 0 : index
    %c0_13 = arith.constant 0 : index
    %c0_14 = arith.constant 0 : index
    %14 = vector.load %arg5[%c0_12, %c0_13, %c0_14] : memref<1x4x1xf32, #tpu.memory_space<vmem>>, vector<1x4x1xf32>
    %15 = vector.broadcast %14 : vector<1x4x1xf32> to vector<4x4x4xf32>
    %16 = arith.addf %13, %15 : vector<4x4x4xf32>
    %c0_15 = arith.constant 0 : index
    %c0_16 = arith.constant 0 : index
    %17 = vector.load %arg11[%c0_15, %c0_16] : memref<4x8xf32, #tpu.memory_space<vmem>>, vector<4x8xf32>
    %18 = vector.shape_cast %17 : vector<4x8xf32> to vector<1x4x8xf32>
    %19 = vector.shape_cast %18 : vector<1x4x8xf32> to vector<1x4x8xf32>
    %20 = vector.broadcast %19 : vector<1x4x8xf32> to vector<4x4x8xf32>
    "tpu.trace_start"() <{level = 10 : i32, message = "acb,abj->acj"}> : () -> ()
    %cst_17 = arith.constant dense<0.000000e+00> : vector<4x4x8xf32>
    %21 = tpu.matmul %16, %20, %cst_17 {dimension_numbers = #tpu.dot_dimension_numbers<[2], [1], [1], [2], [0, 0, 0, 1, 1, 2], [0], [0]>} : vector<4x4x4xf32>, vector<4x4x8xf32>, vector<4x4x8xf32> -> vector<4x4x8xf32>
    "tpu.trace_stop"() : () -> ()
    %c0_18 = arith.constant 0 : index
    %c0_19 = arith.constant 0 : index
    %22 = vector.load %arg10[%c0_18, %c0_19] : memref<8x4xf32, #tpu.memory_space<vmem>>, vector<8x4xf32>
    %23 = vector.extract_strided_slice %22 {offsets = [0, 0], sizes = [8, 1], strides = [1, 1]} : vector<8x4xf32> to vector<8x1xf32>
    %24 = vector.shape_cast %23 : vector<8x1xf32> to vector<8x1x1xf32>
    %25 = vector.extract_strided_slice %21 {offsets = [0, 0, 0], sizes = [1, 4, 8], strides = [1, 1, 1]} : vector<4x4x8xf32> to vector<1x4x8xf32>
    %26 = vector.shape_cast %25 : vector<1x4x8xf32> to vector<4x8xf32>
    %27 = vector.shape_cast %26 : vector<4x8xf32> to vector<1x4x8xf32>
    %28 = vector.broadcast %24 : vector<8x1x1xf32> to vector<8x4x8xf32>
    %29 = vector.broadcast %27 : vector<1x4x8xf32> to vector<8x4x8xf32>
    %30 = arith.mulf %28, %29 : vector<8x4x8xf32>
    %31 = vector.extract_strided_slice %22 {offsets = [0, 1], sizes = [8, 1], strides = [1, 1]} : vector<8x4xf32> to vector<8x1xf32>
    %32 = vector.shape_cast %31 : vector<8x1xf32> to vector<8x1x1xf32>
    %33 = vector.extract_strided_slice %21 {offsets = [1, 0, 0], sizes = [1, 4, 8], strides = [1, 1, 1]} : vector<4x4x8xf32> to vector<1x4x8xf32>
    %34 = vector.shape_cast %33 : vector<1x4x8xf32> to vector<4x8xf32>
    %35 = vector.shape_cast %34 : vector<4x8xf32> to vector<1x4x8xf32>
    %36 = vector.broadcast %32 : vector<8x1x1xf32> to vector<8x4x8xf32>
    %37 = vector.broadcast %35 : vector<1x4x8xf32> to vector<8x4x8xf32>
    %38 = arith.mulf %36, %37 : vector<8x4x8xf32>
    %39 = arith.addf %30, %38 : vector<8x4x8xf32>
    %40 = vector.extract_strided_slice %22 {offsets = [0, 2], sizes = [8, 1], strides = [1, 1]} : vector<8x4xf32> to vector<8x1xf32>
    %41 = vector.shape_cast %40 : vector<8x1xf32> to vector<8x1x1xf32>
    %42 = vector.extract_strided_slice %21 {offsets = [2, 0, 0], sizes = [1, 4, 8], strides = [1, 1, 1]} : vector<4x4x8xf32> to vector<1x4x8xf32>
    %43 = vector.shape_cast %42 : vector<1x4x8xf32> to vector<4x8xf32>
    %44 = vector.shape_cast %43 : vector<4x8xf32> to vector<1x4x8xf32>
    %45 = vector.broadcast %41 : vector<8x1x1xf32> to vector<8x4x8xf32>
    %46 = vector.broadcast %44 : vector<1x4x8xf32> to vector<8x4x8xf32>
    %47 = arith.mulf %45, %46 : vector<8x4x8xf32>
    %48 = arith.addf %39, %47 : vector<8x4x8xf32>
    %49 = vector.extract_strided_slice %22 {offsets = [0, 3], sizes = [8, 1], strides = [1, 1]} : vector<8x4xf32> to vector<8x1xf32>
    %50 = vector.shape_cast %49 : vector<8x1xf32> to vector<8x1x1xf32>
    %51 = vector.extract_strided_slice %21 {offsets = [3, 0, 0], sizes = [1, 4, 8], strides = [1, 1, 1]} : vector<4x4x8xf32> to vector<1x4x8xf32>
    %52 = vector.shape_cast %51 : vector<1x4x8xf32> to vector<4x8xf32>
    %53 = vector.shape_cast %52 : vector<4x8xf32> to vector<1x4x8xf32>
    %54 = vector.broadcast %50 : vector<8x1x1xf32> to vector<8x4x8xf32>
    %55 = vector.broadcast %53 : vector<1x4x8xf32> to vector<8x4x8xf32>
    %56 = arith.mulf %54, %55 : vector<8x4x8xf32>
    %57 = arith.addf %48, %56 : vector<8x4x8xf32>
    %58 = arith.addf %8, %57 : vector<8x4x8xf32>
    %cst_20 = arith.constant 0.000000e+00 : f32
    %59 = vector.broadcast %cst_20 : f32 to vector<8x4x8xf32>
    %60 = arith.maximumf %58, %59 : vector<8x4x8xf32>
    %c0_21 = arith.constant 0 : index
    %c0_22 = arith.constant 0 : index
    %c0_23 = arith.constant 0 : index
    %61 = vector.load %arg6[%c0_21, %c0_22, %c0_23] : memref<1x4x1xf32, #tpu.memory_space<vmem>>, vector<1x4x1xf32>
    %62 = vector.broadcast %61 : vector<1x4x1xf32> to vector<8x4x8xf32>
    %63 = arith.mulf %60, %62 : vector<8x4x8xf32>
    %cst_24 = arith.constant dense<0.000000e+00> : vector<8x8xf32>
    %64 = vector.multi_reduction <add>, %63, %cst_24 [1] : vector<8x4x8xf32> to vector<8x8xf32>
    %c0_25 = arith.constant 0 : index
    %c0_26 = arith.constant 0 : index
    %65 = vector.load %arg7[%c0_25, %c0_26] : memref<1x1xf32, #tpu.memory_space<vmem>>, vector<1x1xf32>
    %66 = vector.broadcast %65 : vector<1x1xf32> to vector<8x8xf32>
    %67 = arith.addf %64, %66 : vector<8x8xf32>
    %68 = arith.negf %67 : vector<8x8xf32>
    %69 = math.exp %68 : vector<8x8xf32>
    %cst_27 = arith.constant 1.000000e+00 : f32
    %70 = vector.broadcast %cst_27 : f32 to vector<8x8xf32>
    %71 = arith.addf %70, %69 : vector<8x8xf32>
    %72 = arith.divf %70, %71 : vector<8x8xf32>
    %c0_28 = arith.constant 0 : index
    %c0_29 = arith.constant 0 : index
    %73 = vector.load %arg8[%c0_28, %c0_29] : memref<4x4xf32, #tpu.memory_space<vmem>>, vector<4x4xf32>
    %74 = vector.shape_cast %73 : vector<4x4xf32> to vector<1x4x4xf32>
    %75 = vector.shape_cast %74 : vector<1x4x4xf32> to vector<1x4x4xf32>
    %76 = vector.broadcast %75 : vector<1x4x4xf32> to vector<8x4x4xf32>
    %c0_30 = arith.constant 0 : index
    %c0_31 = arith.constant 0 : index
    %c0_32 = arith.constant 0 : index
    %77 = vector.load %arg12[%c0_30, %c0_31, %c0_32] : memref<2x8x8xf32, #tpu.memory_space<vmem>>, vector<1x8x8xf32>
    %78 = vector.shape_cast %77 : vector<1x8x8xf32> to vector<8x8xf32>
    %cst_33 = arith.constant dense<0.000000e+00> : vector<8x8xf32>
    %79 = tpu.matmul %78, %72, %cst_33 {dimension_numbers = #tpu.dot_dimension_numbers<[1], [0], [0], [1], [0, 0, 1, 1], [], []>} : vector<8x8xf32>, vector<8x8xf32>, vector<8x8xf32> -> vector<8x8xf32>
    %c0_34 = arith.constant 0 : index
    %c0_35 = arith.constant 0 : index
    %c0_36 = arith.constant 0 : index
    %80 = vector.load %arg13[%c0_34, %c0_35, %c0_36] : memref<2x8x8xf32, #tpu.memory_space<vmem>>, vector<1x8x8xf32>
    %81 = vector.shape_cast %80 : vector<1x8x8xf32> to vector<8x8xf32>
    %cst_37 = arith.constant dense<0.000000e+00> : vector<8x8xf32>
    %82 = tpu.matmul %79, %81, %cst_37 {dimension_numbers = #tpu.dot_dimension_numbers<[1], [0], [0], [1], [0, 0, 1, 1], [], []>} : vector<8x8xf32>, vector<8x8xf32>, vector<8x8xf32> -> vector<8x8xf32>
    %83 = vector.extract_strided_slice %1 {offsets = [0, 0, 0], sizes = [8, 4, 8], strides = [1, 1, 1]} : vector<8x16x8xf32> to vector<8x4x8xf32>
    "tpu.trace_start"() <{level = 10 : i32, message = "idc,icw->idw"}> : () -> ()
    %cst_38 = arith.constant dense<0.000000e+00> : vector<8x4x8xf32>
    %84 = tpu.matmul %76, %83, %cst_38 {dimension_numbers = #tpu.dot_dimension_numbers<[2], [1], [1], [2], [0, 0, 0, 1, 1, 2], [0], [0]>} : vector<8x4x4xf32>, vector<8x4x8xf32>, vector<8x4x8xf32> -> vector<8x4x8xf32>
    "tpu.trace_stop"() : () -> ()
    %85 = vector.shape_cast %82 : vector<8x8xf32> to vector<8x1x8xf32>
    %86 = vector.broadcast %85 : vector<8x1x8xf32> to vector<8x4x8xf32>
    %87 = arith.mulf %86, %84 : vector<8x4x8xf32>
    %c0_39 = arith.constant 0 : index
    %c0_40 = arith.constant 0 : index
    %c0_41 = arith.constant 0 : index
    %88 = vector.load %arg9[%c0_39, %c0_40, %c0_41] : memref<1x4x1xf32, #tpu.memory_space<vmem>>, vector<1x4x1xf32>
    %89 = vector.broadcast %88 : vector<1x4x1xf32> to vector<8x4x8xf32>
    %90 = arith.addf %87, %89 : vector<8x4x8xf32>
    %c0_42 = arith.constant 0 : index
    %c0_43 = arith.constant 0 : index
    %c0_44 = arith.constant 0 : index
    %c0_45 = arith.constant 0 : index
    %91 = vector.load %arg14[%c0_42, %c0_43, %c0_44, %c0_45] : memref<1x8x16x8xf32, #tpu.memory_space<vmem>>, vector<1x8x4x8xf32>
    %92 = vector.shape_cast %91 : vector<1x8x4x8xf32> to vector<8x4x8xf32>
    %93 = vector.shape_cast %90 : vector<8x4x8xf32> to vector<1x8x4x8xf32>
    tpu.vector_store %arg14[%c0_42, %c0_43, %c0_44, %c0_45], %93 {strides = array<i32>} : memref<1x8x16x8xf32, #tpu.memory_space<vmem>>, vector<1x8x4x8xf32>,
    %cst_46 = arith.constant dense<0.000000e+00> : vector<8x4xf32>
    %94 = vector.multi_reduction <add>, %90, %cst_46 [2] : vector<8x4x8xf32> to vector<8x4xf32>
    %95 = vector.shape_cast %94 : vector<8x4xf32> to vector<8x4x1xf32>
    %cst_47 = arith.constant dense<0.000000e+00> : vector<4x1xf32>
    %96 = vector.multi_reduction <add>, %95, %cst_47 [0] : vector<8x4x1xf32> to vector<4x1xf32>
    %97 = vector.shape_cast %96 : vector<4x1xf32> to vector<1x4x1xf32>
    %c0_48 = arith.constant 0 : index
    %c0_49 = arith.constant 0 : index
    %c0_50 = arith.constant 0 : index
    %98 = vector.load %arg12[%c0_48, %c0_49, %c0_50] : memref<2x8x8xf32, #tpu.memory_space<vmem>>, vector<1x8x8xf32>
    %99 = vector.shape_cast %98 : vector<1x8x8xf32> to vector<8x8xf32>
    %cst_51 = arith.constant dense<0.000000e+00> : vector<8x8xf32>
    %100 = tpu.matmul %99, %72, %cst_51 {dimension_numbers = #tpu.dot_dimension_numbers<[1], [0], [0], [1], [0, 0, 1, 1], [], []>} : vector<8x8xf32>, vector<8x8xf32>, vector<8x8xf32> -> vector<8x8xf32>
    %c1 = arith.constant 1 : index
    %c0_52 = arith.constant 0 : index
    %c0_53 = arith.constant 0 : index
    %101 = vector.load %arg13[%c1, %c0_52, %c0_53] : memref<2x8x8xf32, #tpu.memory_space<vmem>>, vector<1x8x8xf32>
    %102 = vector.shape_cast %101 : vector<1x8x8xf32> to vector<8x8xf32>
    %cst_54 = arith.constant dense<0.000000e+00> : vector<8x8xf32>
    %103 = tpu.matmul %100, %102, %cst_54 {dimension_numbers = #tpu.dot_dimension_numbers<[1], [0], [0], [1], [0, 0, 1, 1], [], []>} : vector<8x8xf32>, vector<8x8xf32>, vector<8x8xf32> -> vector<8x8xf32>
    %104 = vector.extract_strided_slice %1 {offsets = [0, 4, 0], sizes = [8, 4, 8], strides = [1, 1, 1]} : vector<8x16x8xf32> to vector<8x4x8xf32>
    "tpu.trace_start"() <{level = 10 : i32, message = "idc,icw->idw"}> : () -> ()
    %cst_55 = arith.constant dense<0.000000e+00> : vector<8x4x8xf32>
    %105 = tpu.matmul %76, %104, %cst_55 {dimension_numbers = #tpu.dot_dimension_numbers<[2], [1], [1], [2], [0, 0, 0, 1, 1, 2], [0], [0]>} : vector<8x4x4xf32>, vector<8x4x8xf32>, vector<8x4x8xf32> -> vector<8x4x8xf32>
    "tpu.trace_stop"() : () -> ()
    %106 = vector.shape_cast %103 : vector<8x8xf32> to vector<8x1x8xf32>
    %107 = vector.broadcast %106 : vector<8x1x8xf32> to vector<8x4x8xf32>
    %108 = arith.mulf %107, %105 : vector<8x4x8xf32>
    %c0_56 = arith.constant 0 : index
    %c0_57 = arith.constant 0 : index
    %c0_58 = arith.constant 0 : index
    %109 = vector.load %arg9[%c0_56, %c0_57, %c0_58] : memref<1x4x1xf32, #tpu.memory_space<vmem>>, vector<1x4x1xf32>
    %110 = vector.broadcast %109 : vector<1x4x1xf32> to vector<8x4x8xf32>
    %111 = arith.addf %108, %110 : vector<8x4x8xf32>
    %c0_59 = arith.constant 0 : index
    %c0_60 = arith.constant 0 : index
    %c4 = arith.constant 4 : index
    %c0_61 = arith.constant 0 : index
    %112 = vector.load %arg14[%c0_59, %c0_60, %c4, %c0_61] : memref<1x8x16x8xf32, #tpu.memory_space<vmem>>, vector<1x8x4x8xf32>
    %113 = vector.shape_cast %112 : vector<1x8x4x8xf32> to vector<8x4x8xf32>
    %114 = vector.shape_cast %111 : vector<8x4x8xf32> to vector<1x8x4x8xf32>
    tpu.vector_store %arg14[%c0_59, %c0_60, %c4, %c0_61], %114 {strides = array<i32>} : memref<1x8x16x8xf32, #tpu.memory_space<vmem>>, vector<1x8x4x8xf32>,
    %cst_62 = arith.constant dense<0.000000e+00> : vector<8x4xf32>
    %115 = vector.multi_reduction <add>, %111, %cst_62 [2] : vector<8x4x8xf32> to vector<8x4xf32>
    %116 = vector.shape_cast %115 : vector<8x4xf32> to vector<8x4x1xf32>
    %cst_63 = arith.constant dense<0.000000e+00> : vector<4x1xf32>
    %117 = vector.multi_reduction <add>, %116, %cst_63 [0] : vector<8x4x1xf32> to vector<4x1xf32>
    %118 = vector.shape_cast %117 : vector<4x1xf32> to vector<1x4x1xf32>
    %119 = arith.addf %97, %118 : vector<1x4x1xf32>
    %c1_64 = arith.constant 1 : index
    %c0_65 = arith.constant 0 : index
    %c0_66 = arith.constant 0 : index
    %120 = vector.load %arg12[%c1_64, %c0_65, %c0_66] : memref<2x8x8xf32, #tpu.memory_space<vmem>>, vector<1x8x8xf32>
    %121 = vector.shape_cast %120 : vector<1x8x8xf32> to vector<8x8xf32>
    %cst_67 = arith.constant dense<0.000000e+00> : vector<8x8xf32>
    %122 = tpu.matmul %121, %72, %cst_67 {dimension_numbers = #tpu.dot_dimension_numbers<[1], [0], [0], [1], [0, 0, 1, 1], [], []>} : vector<8x8xf32>, vector<8x8xf32>, vector<8x8xf32> -> vector<8x8xf32>
    %c0_68 = arith.constant 0 : index
    %c0_69 = arith.constant 0 : index
    %c0_70 = arith.constant 0 : index
    %123 = vector.load %arg13[%c0_68, %c0_69, %c0_70] : memref<2x8x8xf32, #tpu.memory_space<vmem>>, vector<1x8x8xf32>
    %124 = vector.shape_cast %123 : vector<1x8x8xf32> to vector<8x8xf32>
    %cst_71 = arith.constant dense<0.000000e+00> : vector<8x8xf32>
    %125 = tpu.matmul %122, %124, %cst_71 {dimension_numbers = #tpu.dot_dimension_numbers<[1], [0], [0], [1], [0, 0, 1, 1], [], []>} : vector<8x8xf32>, vector<8x8xf32>, vector<8x8xf32> -> vector<8x8xf32>
    %126 = vector.extract_strided_slice %1 {offsets = [0, 8, 0], sizes = [8, 4, 8], strides = [1, 1, 1]} : vector<8x16x8xf32> to vector<8x4x8xf32>
    "tpu.trace_start"() <{level = 10 : i32, message = "idc,icw->idw"}> : () -> ()
    %cst_72 = arith.constant dense<0.000000e+00> : vector<8x4x8xf32>
    %127 = tpu.matmul %76, %126, %cst_72 {dimension_numbers = #tpu.dot_dimension_numbers<[2], [1], [1], [2], [0, 0, 0, 1, 1, 2], [0], [0]>} : vector<8x4x4xf32>, vector<8x4x8xf32>, vector<8x4x8xf32> -> vector<8x4x8xf32>
    "tpu.trace_stop"() : () -> ()
    %128 = vector.shape_cast %125 : vector<8x8xf32> to vector<8x1x8xf32>
    %129 = vector.broadcast %128 : vector<8x1x8xf32> to vector<8x4x8xf32>
    %130 = arith.mulf %129, %127 : vector<8x4x8xf32>
    %c0_73 = arith.constant 0 : index
    %c0_74 = arith.constant 0 : index
    %c0_75 = arith.constant 0 : index
    %131 = vector.load %arg9[%c0_73, %c0_74, %c0_75] : memref<1x4x1xf32, #tpu.memory_space<vmem>>, vector<1x4x1xf32>
    %132 = vector.broadcast %131 : vector<1x4x1xf32> to vector<8x4x8xf32>
    %133 = arith.addf %130, %132 : vector<8x4x8xf32>
    %c0_76 = arith.constant 0 : index
    %c0_77 = arith.constant 0 : index
    %c8 = arith.constant 8 : index
    %c0_78 = arith.constant 0 : index
    %134 = vector.load %arg14[%c0_76, %c0_77, %c8, %c0_78] : memref<1x8x16x8xf32, #tpu.memory_space<vmem>>, vector<1x8x4x8xf32>
    %135 = vector.shape_cast %134 : vector<1x8x4x8xf32> to vector<8x4x8xf32>
    %136 = vector.shape_cast %133 : vector<8x4x8xf32> to vector<1x8x4x8xf32>
    tpu.vector_store %arg14[%c0_76, %c0_77, %c8, %c0_78], %136 {strides = array<i32>} : memref<1x8x16x8xf32, #tpu.memory_space<vmem>>, vector<1x8x4x8xf32>,
    %cst_79 = arith.constant dense<0.000000e+00> : vector<8x4xf32>
    %137 = vector.multi_reduction <add>, %133, %cst_79 [2] : vector<8x4x8xf32> to vector<8x4xf32>
    %138 = vector.shape_cast %137 : vector<8x4xf32> to vector<8x4x1xf32>
    %cst_80 = arith.constant dense<0.000000e+00> : vector<4x1xf32>
    %139 = vector.multi_reduction <add>, %138, %cst_80 [0] : vector<8x4x1xf32> to vector<4x1xf32>
    %140 = vector.shape_cast %139 : vector<4x1xf32> to vector<1x4x1xf32>
    %141 = arith.addf %119, %140 : vector<1x4x1xf32>
    %c1_81 = arith.constant 1 : index
    %c0_82 = arith.constant 0 : index
    %c0_83 = arith.constant 0 : index
    %142 = vector.load %arg12[%c1_81, %c0_82, %c0_83] : memref<2x8x8xf32, #tpu.memory_space<vmem>>, vector<1x8x8xf32>
    %143 = vector.shape_cast %142 : vector<1x8x8xf32> to vector<8x8xf32>
    %cst_84 = arith.constant dense<0.000000e+00> : vector<8x8xf32>
    %144 = tpu.matmul %143, %72, %cst_84 {dimension_numbers = #tpu.dot_dimension_numbers<[1], [0], [0], [1], [0, 0, 1, 1], [], []>} : vector<8x8xf32>, vector<8x8xf32>, vector<8x8xf32> -> vector<8x8xf32>
    %c1_85 = arith.constant 1 : index
    %c0_86 = arith.constant 0 : index
    %c0_87 = arith.constant 0 : index
    %145 = vector.load %arg13[%c1_85, %c0_86, %c0_87] : memref<2x8x8xf32, #tpu.memory_space<vmem>>, vector<1x8x8xf32>
    %146 = vector.shape_cast %145 : vector<1x8x8xf32> to vector<8x8xf32>
    %cst_88 = arith.constant dense<0.000000e+00> : vector<8x8xf32>
    %147 = tpu.matmul %144, %146, %cst_88 {dimension_numbers = #tpu.dot_dimension_numbers<[1], [0], [0], [1], [0, 0, 1, 1], [], []>} : vector<8x8xf32>, vector<8x8xf32>, vector<8x8xf32> -> vector<8x8xf32>
    %148 = vector.extract_strided_slice %1 {offsets = [0, 12, 0], sizes = [8, 4, 8], strides = [1, 1, 1]} : vector<8x16x8xf32> to vector<8x4x8xf32>
    "tpu.trace_start"() <{level = 10 : i32, message = "idc,icw->idw"}> : () -> ()
    %cst_89 = arith.constant dense<0.000000e+00> : vector<8x4x8xf32>
    %149 = tpu.matmul %76, %148, %cst_89 {dimension_numbers = #tpu.dot_dimension_numbers<[2], [1], [1], [2], [0, 0, 0, 1, 1, 2], [0], [0]>} : vector<8x4x4xf32>, vector<8x4x8xf32>, vector<8x4x8xf32> -> vector<8x4x8xf32>
    "tpu.trace_stop"() : () -> ()
    %150 = vector.shape_cast %147 : vector<8x8xf32> to vector<8x1x8xf32>
    %151 = vector.broadcast %150 : vector<8x1x8xf32> to vector<8x4x8xf32>
    %152 = arith.mulf %151, %149 : vector<8x4x8xf32>
    %c0_90 = arith.constant 0 : index
    %c0_91 = arith.constant 0 : index
    %c0_92 = arith.constant 0 : index
    %153 = vector.load %arg9[%c0_90, %c0_91, %c0_92] : memref<1x4x1xf32, #tpu.memory_space<vmem>>, vector<1x4x1xf32>
    %154 = vector.broadcast %153 : vector<1x4x1xf32> to vector<8x4x8xf32>
    %155 = arith.addf %152, %154 : vector<8x4x8xf32>
    %c0_93 = arith.constant 0 : index
    %c0_94 = arith.constant 0 : index
    %c12 = arith.constant 12 : index
    %c0_95 = arith.constant 0 : index
    %156 = vector.load %arg14[%c0_93, %c0_94, %c12, %c0_95] : memref<1x8x16x8xf32, #tpu.memory_space<vmem>>, vector<1x8x4x8xf32>
    %157 = vector.shape_cast %156 : vector<1x8x4x8xf32> to vector<8x4x8xf32>
    %158 = vector.shape_cast %155 : vector<8x4x8xf32> to vector<1x8x4x8xf32>
    tpu.vector_store %arg14[%c0_93, %c0_94, %c12, %c0_95], %158 {strides = array<i32>} : memref<1x8x16x8xf32, #tpu.memory_space<vmem>>, vector<1x8x4x8xf32>,
    %cst_96 = arith.constant dense<0.000000e+00> : vector<8x4xf32>
    %159 = vector.multi_reduction <add>, %155, %cst_96 [2] : vector<8x4x8xf32> to vector<8x4xf32>
    %160 = vector.shape_cast %159 : vector<8x4xf32> to vector<8x4x1xf32>
    %cst_97 = arith.constant dense<0.000000e+00> : vector<4x1xf32>
    %161 = vector.multi_reduction <add>, %160, %cst_97 [0] : vector<8x4x1xf32> to vector<4x1xf32>
    %162 = vector.shape_cast %161 : vector<4x1xf32> to vector<1x4x1xf32>
    %163 = arith.addf %141, %162 : vector<1x4x1xf32>
    %cst_98 = arith.constant 2.560000e+02 : f32
    %164 = vector.broadcast %cst_98 : f32 to vector<1x4x1xf32>
    %165 = arith.divf %163, %164 : vector<1x4x1xf32>
    %166 = vector.broadcast %165 : vector<1x4x1xf32> to vector<8x4x8xf32>
    %167 = arith.subf %90, %166 : vector<8x4x8xf32>
    %168 = arith.mulf %167, %167 : vector<8x4x8xf32>
    %cst_99 = arith.constant dense<0.000000e+00> : vector<8x4xf32>
    %169 = vector.multi_reduction <add>, %168, %cst_99 [2] : vector<8x4x8xf32> to vector<8x4xf32>
    %170 = vector.shape_cast %169 : vector<8x4xf32> to vector<8x4x1xf32>
    %cst_100 = arith.constant dense<0.000000e+00> : vector<4x1xf32>
    %171 = vector.multi_reduction <add>, %170, %cst_100 [0] : vector<8x4x1xf32> to vector<4x1xf32>
    %172 = vector.shape_cast %171 : vector<4x1xf32> to vector<1x4x1xf32>
    %173 = vector.broadcast %165 : vector<1x4x1xf32> to vector<8x4x8xf32>
    %174 = arith.subf %111, %173 : vector<8x4x8xf32>
    %175 = arith.mulf %174, %174 : vector<8x4x8xf32>
    %cst_101 = arith.constant dense<0.000000e+00> : vector<8x4xf32>
    %176 = vector.multi_reduction <add>, %175, %cst_101 [2] : vector<8x4x8xf32> to vector<8x4xf32>
    %177 = vector.shape_cast %176 : vector<8x4xf32> to vector<8x4x1xf32>
    %cst_102 = arith.constant dense<0.000000e+00> : vector<4x1xf32>
    %178 = vector.multi_reduction <add>, %177, %cst_102 [0] : vector<8x4x1xf32> to vector<4x1xf32>
    %179 = vector.shape_cast %178 : vector<4x1xf32> to vector<1x4x1xf32>
    %180 = arith.addf %172, %179 : vector<1x4x1xf32>
    %181 = vector.broadcast %165 : vector<1x4x1xf32> to vector<8x4x8xf32>
    %182 = arith.subf %133, %181 : vector<8x4x8xf32>
    %183 = arith.mulf %182, %182 : vector<8x4x8xf32>
    %cst_103 = arith.constant dense<0.000000e+00> : vector<8x4xf32>
    %184 = vector.multi_reduction <add>, %183, %cst_103 [2] : vector<8x4x8xf32> to vector<8x4xf32>
    %185 = vector.shape_cast %184 : vector<8x4xf32> to vector<8x4x1xf32>
    %cst_104 = arith.constant dense<0.000000e+00> : vector<4x1xf32>
    %186 = vector.multi_reduction <add>, %185, %cst_104 [0] : vector<8x4x1xf32> to vector<4x1xf32>
    %187 = vector.shape_cast %186 : vector<4x1xf32> to vector<1x4x1xf32>
    %188 = arith.addf %180, %187 : vector<1x4x1xf32>
    %189 = vector.broadcast %165 : vector<1x4x1xf32> to vector<8x4x8xf32>
    %190 = arith.subf %155, %189 : vector<8x4x8xf32>
    %191 = arith.mulf %190, %190 : vector<8x4x8xf32>
    %cst_105 = arith.constant dense<0.000000e+00> : vector<8x4xf32>
    %192 = vector.multi_reduction <add>, %191, %cst_105 [2] : vector<8x4x8xf32> to vector<8x4xf32>
    %193 = vector.shape_cast %192 : vector<8x4xf32> to vector<8x4x1xf32>
    %cst_106 = arith.constant dense<0.000000e+00> : vector<4x1xf32>
    %194 = vector.multi_reduction <add>, %193, %cst_106 [0] : vector<8x4x1xf32> to vector<4x1xf32>
    %195 = vector.shape_cast %194 : vector<4x1xf32> to vector<1x4x1xf32>
    %196 = arith.addf %188, %195 : vector<1x4x1xf32>
    %c0_107 = arith.constant 0 : index
    %c0_108 = arith.constant 0 : index
    %c0_109 = arith.constant 0 : index
    %c0_110 = arith.constant 0 : index
    %197 = vector.load %arg15[%c0_107, %c0_108, %c0_109, %c0_110] : memref<1x1x4x1xf32, #tpu.memory_space<vmem>>, vector<1x1x4x1xf32>
    %198 = vector.shape_cast %197 : vector<1x1x4x1xf32> to vector<1x4x1xf32>
    %199 = vector.shape_cast %165 : vector<1x4x1xf32> to vector<1x1x4x1xf32>
    tpu.vector_store %arg15[%c0_107, %c0_108, %c0_109, %c0_110], %199 {strides = array<i32>} : memref<1x1x4x1xf32, #tpu.memory_space<vmem>>, vector<1x1x4x1xf32>,
    %c0_111 = arith.constant 0 : index
    %c0_112 = arith.constant 0 : index
    %c0_113 = arith.constant 0 : index
    %c0_114 = arith.constant 0 : index
    %200 = vector.load %arg16[%c0_111, %c0_112, %c0_113, %c0_114] : memref<1x1x4x1xf32, #tpu.memory_space<vmem>>, vector<1x1x4x1xf32>
    %201 = vector.shape_cast %200 : vector<1x1x4x1xf32> to vector<1x4x1xf32>
    %202 = vector.shape_cast %196 : vector<1x4x1xf32> to vector<1x1x4x1xf32>
    tpu.vector_store %arg16[%c0_111, %c0_112, %c0_113, %c0_114], %202 {strides = array<i32>} : memref<1x1x4x1xf32, #tpu.memory_space<vmem>>, vector<1x1x4x1xf32>,
    return
  }
  func.func @transform_0(%arg0: i32) -> (i32, i32, i32, i32) {
    %c0_i32 = arith.constant 0 : i32
    %c0_i32_0 = arith.constant 0 : i32
    %c0_i32_1 = arith.constant 0 : i32
    %c0_i32_2 = arith.constant 0 : i32
    return %arg0, %c0_i32, %c0_i32_0, %c0_i32_1 : i32, i32, i32, i32
  }
  func.func @transform_1(%arg0: i32) -> (i32, i32, i32, i32) {
    %c0_i32 = arith.constant 0 : i32
    %c0_i32_0 = arith.constant 0 : i32
    %c0_i32_1 = arith.constant 0 : i32
    %c0_i32_2 = arith.constant 0 : i32
    return %arg0, %c0_i32, %c0_i32_0, %c0_i32_1 : i32, i32, i32, i32
  }
  func.func @transform_2(%arg0: i32) -> (i32, i32) {
    %c0_i32 = arith.constant 0 : i32
    %c0_i32_0 = arith.constant 0 : i32
    %c0_i32_1 = arith.constant 0 : i32
    return %c0_i32, %c0_i32_0 : i32, i32
  }
  func.func @transform_3(%arg0: i32) -> (i32, i32) {
    %c0_i32 = arith.constant 0 : i32
    %c0_i32_0 = arith.constant 0 : i32
    %c0_i32_1 = arith.constant 0 : i32
    return %c0_i32, %c0_i32_0 : i32, i32
  }
  func.func @transform_4(%arg0: i32) -> (i32, i32, i32) {
    %c0_i32 = arith.constant 0 : i32
    %c0_i32_0 = arith.constant 0 : i32
    %c0_i32_1 = arith.constant 0 : i32
    %c0_i32_2 = arith.constant 0 : i32
    return %c0_i32, %c0_i32_0, %c0_i32_1 : i32, i32, i32
  }
  func.func @transform_5(%arg0: i32) -> (i32, i32, i32) {
    %c0_i32 = arith.constant 0 : i32
    %c0_i32_0 = arith.constant 0 : i32
    %c0_i32_1 = arith.constant 0 : i32
    %c0_i32_2 = arith.constant 0 : i32
    return %c0_i32, %c0_i32_0, %c0_i32_1 : i32, i32, i32
  }
  func.func @transform_6(%arg0: i32) -> (i32, i32) {
    %c0_i32 = arith.constant 0 : i32
    %c0_i32_0 = arith.constant 0 : i32
    %c0_i32_1 = arith.constant 0 : i32
    return %c0_i32, %c0_i32_0 : i32, i32
  }
  func.func @transform_7(%arg0: i32) -> (i32, i32) {
    %c0_i32 = arith.constant 0 : i32
    %c0_i32_0 = arith.constant 0 : i32
    %c0_i32_1 = arith.constant 0 : i32
    return %c0_i32, %c0_i32_0 : i32, i32
  }
  func.func @transform_8(%arg0: i32) -> (i32, i32, i32) {
    %c0_i32 = arith.constant 0 : i32
    %c0_i32_0 = arith.constant 0 : i32
    %c0_i32_1 = arith.constant 0 : i32
    %c0_i32_2 = arith.constant 0 : i32
    return %c0_i32, %c0_i32_0, %c0_i32_1 : i32, i32, i32
  }
  func.func @transform_9(%arg0: i32) -> (i32, i32) {
    %c0_i32 = arith.constant 0 : i32
    %c0_i32_0 = arith.constant 0 : i32
    %c0_i32_1 = arith.constant 0 : i32
    return %c0_i32, %c0_i32_0 : i32, i32
  }
  func.func @transform_10(%arg0: i32) -> (i32, i32) {
    %c0_i32 = arith.constant 0 : i32
    %c0_i32_0 = arith.constant 0 : i32
    %c0_i32_1 = arith.constant 0 : i32
    return %c0_i32, %c0_i32_0 : i32, i32
  }
  func.func @transform_11(%arg0: i32) -> (i32, i32, i32) {
    %c0_i32 = arith.constant 0 : i32
    %c0_i32_0 = arith.constant 0 : i32
    %c0_i32_1 = arith.constant 0 : i32
    %c0_i32_2 = arith.constant 0 : i32
    return %c0_i32, %c0_i32_0, %c0_i32_1 : i32, i32, i32
  }
  func.func @transform_12(%arg0: i32) -> (i32, i32, i32) {
    %c0_i32 = arith.constant 0 : i32
    %c0_i32_0 = arith.constant 0 : i32
    %c0_i32_1 = arith.constant 0 : i32
    %c0_i32_2 = arith.constant 0 : i32
    return %c0_i32, %c0_i32_0, %c0_i32_1 : i32, i32, i32
  }
  func.func @transform_13(%arg0: i32) -> (i32, i32, i32, i32) {
    %c0_i32 = arith.constant 0 : i32
    %c0_i32_0 = arith.constant 0 : i32
    %c0_i32_1 = arith.constant 0 : i32
    %c0_i32_2 = arith.constant 0 : i32
    return %arg0, %c0_i32, %c0_i32_0, %c0_i32_1 : i32, i32, i32, i32
  }
  func.func @transform_14(%arg0: i32) -> (i32, i32, i32, i32) {
    %c0_i32 = arith.constant 0 : i32
    %c0_i32_0 = arith.constant 0 : i32
    %c0_i32_1 = arith.constant 0 : i32
    %c0_i32_2 = arith.constant 0 : i32
    return %arg0, %c0_i32, %c0_i32_0, %c0_i32_1 : i32, i32, i32, i32
  }
  func.func @transform_15(%arg0: i32) -> (i32, i32, i32, i32) {
    %c0_i32 = arith.constant 0 : i32
    %c0_i32_0 = arith.constant 0 : i32
    %c0_i32_1 = arith.constant 0 : i32
    %c0_i32_2 = arith.constant 0 : i32
    return %arg0, %c0_i32, %c0_i32_0, %c0_i32_1 : i32, i32, i32, i32
  }
}

</mosaic_0001>

<bundles_post_ra>
// kernel: tpu_custom_call.1
= control target key start
LH: loop header
LB: loop body
LE: loop exit
PB: predicated region body
PF: predicated region fallthrough
CT: control target
= control target key end

     0   :  { %s6813_s20 = smov 0   ;;  %s7898_s0 = inlined_call_operand.vmem [shape: f32[2,8,16,8], index: 0, kind: input, shape index: {}]   ;;  %s7899_s1 = inlined_call_operand.vmem [shape: f32[2,4,8,4], index: 1, kind: input, shape index: {}]   ;;  %s7900_s2 = inlined_call_operand.vmem [shape: f32[4,16], index: 2, kind: input, shape index: {}]   ;;  %s7901_s3 = inlined_call_operand.vmem [shape: f32[4,8], index: 3, kind: input, shape index: {}]   ;;  %s7902_s4 = inlined_call_operand.vmem [shape: f32[1,4,1], index: 4, kind: input, shape index: {}]   ;;  %s7903_s5 = inlined_call_operand.vmem [shape: f32[1,4,1], index: 5, kind: input, shape index: {}]   ;;  %s7904_s6 = inlined_call_operand.<no memory space> [shape: f32[1,1], index: 6, kind: input, shape index: {}]   ;;  %s7905_s7 = inlined_call_operand.vmem [shape: f32[4,4], index: 7, kind: input, shape index: {}]   ;;  %s7906_s8 = inlined_call_operand.vmem [shape: f32[1,4,1], index: 8, kind: input, shape index: {}]   ;;  %s7907_s9 = inlined_call_operand.vmem [shape: f32[8,4], index: 9, kind: input, shape index: {}]   ;;  %s7908_s10 = inlined_call_operand.vmem [shape: f32[4,8], index: 10, kind: input, shape index: {}]   ;;  %s7909_s11 = inlined_call_operand.vmem [shape: f32[2,8,8], index: 11, kind: input, shape index: {}]   ;;  %s7910_s12 = inlined_call_operand.vmem [shape: f32[2,8,8], index: 12, kind: input, shape index: {}]   ;;  %s7911_s13 = inlined_call_operand.vmem [shape: f32[2,8,16,8], index: 13, kind: output, shape index: {0}]   ;;  %s7912_s14 = inlined_call_operand.vmem [shape: f32[2,1,4,1], index: 14, kind: output, shape index: {1}]   ;;  %s7913_s15 = inlined_call_operand.vmem [shape: f32[2,1,4,1], index: 15, kind: output, shape index: {2}]  }
   0x1   :  { %v21_v0 = vstv %s7904_s6 }
   0x2   :  { %22 = vst [vmem:[#allocation2] sm:$0x1] %v21_v0 }
   0x3 LB: > { %s6077_s21 = sadd.s32 4294967295, %s6720_s20   ;;  %p6081_p0 = scmp.ge.s32.totalorder %s6720_s20, 1  ;;  %s6720_s20 = sphi %s6813_s20, %s28_s20  }
   0x4   : > { %p454_p1 = scmp.lt.s32.totalorder %s6720_s20, 3 }
   0x6   : > { %p455_p2 = pnand %p6081_p0, %p454_p1 }
   0x8   : > { %458 = sbr.rel (%p455_p2) target bundleno = 1403 (0x57b), region = 72 }
   0xf   : > { %p515_p3 = scmp.lt.s32.totalorder %s6077_s21, 1  ;;  %v1154_v1 = vlaneseq  ;;  %v7914_v2 = vmov 0.0   ;;  %v560_v3 = vld [vmem:[%s7902_s4] sm:$0xf]  ;;  %vm6723_vm0 = vmmov 0   ;;  %v6725_v7 = vmov 0  }
  0x10   : > { %6320 = vmatprep.subr.mxu0 %v7914_v2  ;;  %6325 = vmatprep.subr.mxu1 %v7914_v2  ;;  %v6724_v4 = vmov 1966171168   ;;  %v6726_v9 = vmov 1   ;;  %v559_v10 = vld [vmem:[%s7901_s3] sm:$0xf]  ;;  %vm566_vm1 = vcmask 64512  }
  0x11   : > { %s7936_s21 = smov (!%p515_p3, %s6077_s21), 1  ;;  %6322 = vmatprep.mubr.msk.f32.mxu0 %vm6723_vm0, %v7914_v2  ;;  %6327 = vmatprep.mubr.msk.f32.mxu1 %vm6723_vm0, %v7914_v2  ;;  %v1152_v5 = vunpack.c.l.s4 %v6724_v4  ;;  %v1155_v6 = vshrl.u32 %v1154_v1, 7  ;;  %v1148_v11 = vld [vmem:[%s7907_s9] sm:$0xff]  ;;  %vm855_vm2 = vcmask 1043456   ;;  %v6727_v30 = vmov 2  }
  0x12   : > { %6656 = vset.pattern.permute.xlu0 %v6725_v7  ;;  %s6198_s23 = sshll.u32 %s7936_s21, 5  ;;  %6657 = vset.pattern.permute.xlu1 %v6726_v9  ;;  %v6878_v27 = vld [vmem:[%s7908_s10] sm:$0xf]  ;;  %v1150_v29 = vcombine.high %v1148_v11, %v1148_v11  ;;  %v6728_v40 = vmov 3   ;;  %s6197_s29 = sshll.u32 %s7936_s21, 7  ;;  %vm851_vm3 = vcmask 31744  }
  0x13   : > { %563 = vperm.xlu0 %6656, %v560_v3   ;;  %v1153_v8 = vunpack.c.0.s8 %v1152_v5  ;;  %s524_s26 = scalar_lea.vmem %s7899_s1, %s6198_s23  ;;  %v6849_v18 = vsub.s32 0, %v1155_v6  ;;  %v1987_v42 = vld [vmem:[%s7903_s5] sm:$0xf]  ;;  %s6927_s17 = scalar_lea.vmem %s7898_s0, %s6197_s29  ;;  %vm1415_vm4 = vcmask 130048   ;;  %vm2001_vm5 = vcmask 60416  }
  0x14   : > { %v554_v12 = vld [vmem:[%s524_s26] sm:$0xff]  ;;  %v555_v13 = vld [vmem:[%s524_s26 + $0x8] sm:$0xff]  ;;  %v556_v15 = vld [vmem:[%s524_s26 + $0x10] sm:$0xff]  ;;  %vm2134_vm6 = vcmask 1041409   ;;  %vm2136_vm7 = vcmask 1042434   ;;  %vm2138_vm8 = vcmask 1043459   ;;  %s7426_s19 = scalar_lea.vmem %s7911_s13, %s6197_s29 }
  0x15   : > { %v6844_v14 = vsub.s32 %v1153_v8, %v1155_v6  ;;  %6321 = vmatpush3.msra.mxu0 %v554_v12  ;;  %6326 = vmatpush3.msra.mxu1 %v555_v13  ;;  %v557_v16 = vld [vmem:[%s524_s26 + $0x18] sm:$0xff]  ;;  %7925 = vst [vmem:[#allocation4_spill] sm:$0xff] %v6849_v18  ;;  %v3873_v43 = vld [vmem:[%s7906_s8] sm:$0xf]  ;;  %v6933_v56 = vld [vmem:[%s6927_s17 + $0x8] sm:$0xff]  ;;  %v6729_v8 = vmov 0.0|0.0  }
  0x16   : > { %6323 = vmatmul.mubr.msk.f32.vlgmr.msra.gmra.mrb[0].mxu0 %vm566_vm1, %v559_v10  ;;  %6328 = vmatmul.mubr.msk.f32.vlgmr.msra.gmra.mrb[0].mxu1 %vm566_vm1, %v559_v10  ;;  %v5658_v44 = vld [vmem:[%s7906_s8] sm:$0xf]  ;;  %v6936_v57 = vld [vmem:[%s6927_s17 + $0x10] sm:$0xff]  ;;  %v6939_v58 = vld [vmem:[%s6927_s17 + $0x18] sm:$0xff]  ;;  %vm2140_vm9 = vcmask 1044484   ;;  %vm2142_vm10 = vcmask 1045509  }
  0x17   : > { %7924 = vst [vmem:[#allocation3_spill] sm:$0xff] %v6844_v14  ;;  %v1157_v17 = vrot.slane %v1148_v11, %v6844_v14  ;;  %6330 = vmatprep.subr.mxu0 %v7914_v2  ;;  %6335 = vmatprep.subr.mxu1 %v7914_v2  ;;  %v1164_v31 = vrot.slane %v1150_v29, %v6844_v14  ;;  %v6110_v45 = vld [vmem:[#allocation2] ss:$0 sm:$0xff]  ;;  %v6959_v5 = vld [vmem:[%s6927_s17 + $0x28] sm:$0xff]  ;;  %v6962_v6 = vld [vmem:[%s6927_s17 + $0x30] sm:$0xff]  ;;  %vm2144_vm11 = vcmask 1046534  }
  0x18   : > { %6331 = vmatpush3.msra.mxu0 %v556_v15  ;;  %6332 = vmatprep.mubr.msk.f32.mxu0 %vm6723_vm0, %v7914_v2  ;;  %v2981_v46 = vld [vmem:[%s7906_s8] sm:$0xf]  ;;  %v6620_v62 = vpack.c.bf16 %v6939_v58, %v6936_v57  ;;  %v6984_v13 = vld [vmem:[%s6927_s17 + $0x48] sm:$0xff]  ;;  %v6987_v15 = vld [vmem:[%s6927_s17 + $0x50] sm:$0xff]  ;;  %vm2146_vm12 = vcmask 1047559   ;;  %s6088_s29 = sshll.u32 %s7936_s21, 2 }
  0x19   : > { %v1173_v19 = vrot.slane %v1157_v17, %v6844_v14  ;;  %v1165_v20 = vcombine.high %v1157_v17, %v1157_v17  ;;  %6336 = vmatpush3.msra.mxu1 %v557_v16  ;;  %6337 = vmatprep.mubr.msk.f32.mxu1 %vm6723_vm0, %v7914_v2  ;;  %v1180_v32 = vrot.slane %v1164_v31, %v6844_v14  ;;  %v4766_v47 = vld [vmem:[%s7906_s8] sm:$0xf]  ;;  %v6990_v16 = vld [vmem:[%s6927_s17 + $0x58] sm:$0xff]  ;;  %s533_s23 = scalar_lea.vmem %s7912_s14, %s6088_s29  ;;  %vm5945_vm13 = vcmask 3072   ;;  %s537_s26 = scalar_lea.vmem %s7913_s15, %s6088_s29 }
  0x1a   : > { %6333 = vmatmul.mubr.msk.f32.vlgmr.msra.gmra.mrb[2].mxu0 %vm566_vm1, %v559_v10  ;;  %6338 = vmatmul.mubr.msk.f32.vlgmr.msra.gmra.mrb[2].mxu1 %vm566_vm1, %v559_v10  ;;  %v1166_v34 = vcombine.high %v1164_v31, %v1164_v31  ;;  %v6930_v51 = vld [vmem:[%s6927_s17] sm:$0xff] }
  0x1b   : > { %v1202_v21 = vrot.slane %v1173_v19, %v6849_v18  ;;  %v1187_v22 = vrot.slane %v1165_v20, %v6844_v14  ;;  %6340 = vmatprep.subr.mxu0 %v7914_v2  ;;  %6345 = vmatprep.subr.mxu1 %v7914_v2  ;;  %v1195_v26 = vcombine.high %v1173_v19, %v1173_v19  ;;  %v6952_v63 = vld [vmem:[%s6927_s17 + $0x20] sm:$0xff] }
  0x1c   : > { %6342 = vmatprep.mubr.msk.f32.mxu0 %vm6723_vm0, %v7914_v2  ;;  %6347 = vmatprep.mubr.msk.f32.mxu1 %vm6723_vm0, %v7914_v2  ;;  %v1218_v33 = vrot.slane %v1180_v32, %v6849_v18  ;;  %v1194_v35 = vrot.slane %v1166_v34, %v6844_v14  ;;  %v1196_v39 = vcombine.high %v1180_v32, %v1180_v32  ;;  %v6977_v12 = vld [vmem:[%s6927_s17 + $0x40] sm:$0xff] }
  0x1d   : > { %1232 = vperm.xlu0 %6656, %v1202_v21   ;;  %v1197_v23 = vcombine.high %v1187_v22, %v1187_v22  ;;  %1272 = vperm.xlu1 %6657, %v1202_v21   ;;  %v1206_v24 = vrot.slane %v1187_v22, %v6849_v18  ;;  %v1210_v28 = vrot.slane %v1195_v26, %v6849_v18  ;;  %v6999_v20 = vld [vmem:[%s6927_s17 + $0x60] sm:$0xff]  ;;  %v7009_v22 = vld [vmem:[%s6927_s17 + $0x70] sm:$0xff] }
  0x1e   : > { %6341 = vmatpush3.msk.msra.mxu0 %vm855_vm2, %v6878_v27  ;;  %6346 = vmatpush3.msk.msra.mxu1 %vm855_vm2, %v6878_v27  ;;  %v1222_v36 = vrot.slane %v1194_v35, %v6849_v18  ;;  %v1198_v37 = vcombine.high %v1194_v35, %v1194_v35  ;;  %v1226_v41 = vrot.slane %v1196_v39, %v6849_v18 }
  0x1f   : > { %v6870_v25 = vrot.slane %v1197_v23, %v6849_v18  ;;  %6350 = vmatprep.subr.mxu0 %v7914_v2  ;;  %6355 = vmatprep.subr.mxu1 %v7914_v2  ;;  %v6617_v61 = vpack.c.bf16 %v6933_v56, %v6930_v51  ;;  %v6623_v10 = vpack.c.bf16 %v6959_v5, %v6952_v63  ;;  %v7012_v23 = vld [vmem:[%s6927_s17 + $0x78] sm:$0xff] }
  0x20   : > { %v1230_v38 = vrot.slane %v1198_v37, %v6849_v18  ;;  %v6629_v17 = vpack.c.bf16 %v6984_v13, %v6977_v12  ;;  %v6632_v19 = vpack.c.bf16 %v6990_v16, %v6987_v15  ;;  %7926 = vst [vmem:[#allocation5_spill] sm:$0xff] %v7012_v23 }
  0x21   : > { %1244 = vperm.xlu0 %6656, %v6870_v25   ;;  %6658 = vset.pattern.permute.xlu1 %v6725_v7 }
  0x22   : > { %1236 = vperm.xlu1 %6658, %v1206_v24  }
  0x25   : > { %6660 = vset.pattern.permute.xlu0 %v6726_v9 }
  0x26   : > { %1276 = vperm.xlu0 %6660, %v1206_v24   ;;  %1240 = vperm.xlu1 %6658, %v1210_v28  }
  0x2a   : > { %6659 = vset.pattern.permute.xlu1 %v6726_v9  ;;  %1292 = vperm.xlu0 %6660, %v1222_v36  }
  0x2b   : > { %1280 = vperm.xlu1 %6659, %v1210_v28  }
  0x2e   : > { %1300 = vperm.xlu0 %6660, %v1230_v38  }
  0x2f   : > { %1284 = vperm.xlu1 %6659, %v6870_v25  }
  0x32   : > { %6671 = vset.pattern.permute.xlu0 %v6727_v30 }
  0x33   : > { %6661 = vset.pattern.permute.xlu1 %v6727_v30  ;;  %1324 = vperm.xlu0 %6671, %v1206_v24  }
  0x34   : > { %1320 = vperm.xlu1 %6661, %v1202_v21  }
  0x37   : > { %1328 = vperm.xlu0 %6671, %v1210_v28  }
  0x38   : > { %6662 = vset.pattern.permute.xlu1 %v6725_v7 }
  0x39   : > { %1248 = vperm.xlu1 %6662, %v1218_v33  }
  0x3b   : > { %1336 = vperm.xlu0 %6671, %v1218_v33  }
  0x3d   : > { %6663 = vset.pattern.permute.xlu1 %v6726_v9 }
  0x3e   : > { %1288 = vperm.xlu1 %6663, %v1218_v33  }
  0x3f   : > { %1344 = vperm.xlu0 %6671, %v1226_v41  }
  0x42   : > { %6664 = vset.pattern.permute.xlu1 %v6725_v7 }
  0x43   : > { %1252 = vperm.xlu1 %6664, %v1222_v36   ;;  %6674 = vset.pattern.permute.xlu0 %v6728_v40 }
  0x44   : > { %1372 = vperm.xlu0 %6674, %v1206_v24  }
  0x47   : > { %6665 = vset.pattern.permute.xlu1 %v6727_v30 }
  0x48   : > { %1332 = vperm.xlu1 %6665, %v6870_v25   ;;  %1388 = vperm.xlu0 %6674, %v1222_v36  }
  0x4c   : > { %6666 = vset.pattern.permute.xlu1 %v6728_v40  ;;  %6677 = vset.pattern.permute.xlu0 %v6725_v7 }
  0x4d   : > { %1368 = vperm.xlu1 %6666, %v1202_v21   ;;  %1990 = vperm.xlu0 %6677, %v1987_v42   ;;  %v7006_v21 = vld [vmem:[%s6927_s17 + $0x68] sm:$0xff] }
  0x4e   : > { %v6635_v24 = vpack.c.bf16 %v7006_v21, %v6999_v20 }
  0x51   : > { %6667 = vset.pattern.permute.xlu1 %v6725_v7  ;;  %3876 = vperm.xlu0 %6677, %v3873_v43  }
  0x52   : > { %1256 = vperm.xlu1 %6667, %v1226_v41  }
  0x55   : > { %5661 = vperm.xlu0 %6677, %v5658_v44  }
  0x56   : > { %6668 = vset.pattern.permute.xlu1 %v6726_v9  ;;  %v558_v9 = vld [vmem:[%s7900_s2] sm:$0xf] }
  0x57   : > { %1296 = vperm.xlu1 %6668, %v1226_v41  }
  0x5b   : > { %6669 = vset.pattern.permute.xlu1 %v6728_v40 }
  0x5c   : > { %1376 = vperm.xlu1 %6669, %v1210_v28  }
  0x60   : > { %6670 = vset.pattern.permute.xlu1 %v6725_v7 }
  0x61   : > { %1260 = vperm.xlu1 %6670, %v1230_v38  }
  0x65   : > { %6672 = vset.pattern.permute.xlu1 %v6727_v30 }
  0x66   : > { %1340 = vperm.xlu1 %6672, %v1222_v36  }
  0x6a   : > { %6673 = vset.pattern.permute.xlu1 %v6728_v40 }
  0x6b   : > { %1380 = vperm.xlu1 %6673, %v6870_v25   ;;  %v6638_v25 = vpack.c.bf16 %v7012_v23, %v7009_v22 }
  0x6f   : > { %1384 = vperm.xlu1 %6673, %v1218_v33  }
  0x73   : > { %6675 = vset.pattern.permute.xlu1 %v6727_v30 }
  0x74   : > { %1348 = vperm.xlu1 %6675, %v1230_v38  }
  0x78   : > { %6676 = vset.pattern.permute.xlu1 %v6728_v40 }
  0x79   : > { %1392 = vperm.xlu1 %6676, %v1226_v41  }
  0x7d   : > { %1396 = vperm.xlu1 %6676, %v1230_v38  }
  0x81   : > { %6678 = vset.pattern.permute.xlu1 %v6725_v7  ;;  %v6965_v7 = vld [vmem:[%s6927_s17 + $0x38] sm:$0xff] }
  0x82   : > { %2065 = vperm.xlu1 %6678, %v6110_v45   ;;  %v6626_v11 = vpack.c.bf16 %v6965_v7, %v6962_v6 }
  0x86   : > { %2984 = vperm.xlu1 %6678, %v2981_v46  }
  0x8a   : > { %4769 = vperm.xlu1 %6678, %v4766_v47  }
  0x92   : > { %v564_v48 = vpop.permute.xlu0 %563 }
  0x9c   : > { %v1273_v26 = vpop.permute.xlu1 %1272  ;;  %v1233_v36 = vpop.permute.xlu0 %1232 }
  0xa0   : > { %v1245_v38 = vpop.permute.xlu0 %1244 }
  0xa5   : > { %v1277_v40 = vpop.permute.xlu0 %1276 }
  0xa9   : > { %v1293_v42 = vpop.permute.xlu0 %1292 }
  0xad   : > { %v7042_v44 = vpop.permute.xlu0 %1300 }
  0xb2   : > { %v1325_v46 = vpop.permute.xlu0 %1324 }
  0xe9   : > { %v636_v49 = vpop.f32.mrb[0].mxu0  ;;  %v706_v50 = vpop.f32.mrb[0].mxu1 }
  0xea   : > { %v637_v52 = vadd.f32 %v636_v49, %v564_v48  ;;  %v707_v53 = vadd.f32 %v706_v50, %v564_v48  ;;  %v6324_v54 = vpop.f32.mrb[1].mxu0  ;;  %v6329_v55 = vpop.f32.mrb[1].mxu1 }
  0xec   : > { %6343 = vmatmul.mubr.msk.f32.vlgmr.msra.gmra.mrb[4].mxu0 %vm851_vm3, %v637_v52  ;;  %6348 = vmatmul.mubr.msk.f32.vlgmr.msra.gmra.mrb[4].mxu1 %vm851_vm3, %v707_v53 }
  0xed   : > { %v776_v59 = vpop.f32.mrb[2].mxu0  ;;  %v846_v60 = vpop.f32.mrb[2].mxu1  ;;  %6351 = vmatpush3.msk.msra.mxu0 %vm855_vm2, %v6878_v27  ;;  %6352 = vmatprep.mubr.msk.f32.mxu0 %vm6723_vm0, %v7914_v2 }
  0xee   : > { %v777_v0 = vadd.f32 %v776_v59, %v564_v48  ;;  %v847_v1 = vadd.f32 %v846_v60, %v564_v48  ;;  %v6334_v3 = vpop.f32.mrb[3].mxu0  ;;  %v6339_v4 = vpop.f32.mrb[3].mxu1  ;;  %6356 = vmatpush3.msk.msra.mxu1 %vm855_vm2, %v6878_v27  ;;  %6357 = vmatprep.mubr.msk.f32.mxu1 %vm6723_vm0, %v7914_v2 }
  0xef   : > { %6616 = vmatprep.subr.bf16.mxu0 %v6729_v8  ;;  %6619 = vmatprep.subr.bf16.mxu1 %v6729_v8  ;;  %v1237_v27 = vpop.permute.xlu1 %1236  ;;  %v1329_v48 = vpop.permute.xlu0 %1328 }
  0xf0   : > { %6353 = vmatmul.mubr.msk.f32.vlgmr.msra.gmra.mrb[6].mxu0 %vm851_vm3, %v777_v0  ;;  %6358 = vmatmul.mubr.msk.f32.vlgmr.msra.gmra.mrb[6].mxu1 %vm851_vm3, %v847_v1 }
  0xf1   : > { %6618 = vmatpush3.bf16.msra.mxu0 %v6617_v61  ;;  %6621 = vmatpush3.bf16.msra.mxu1 %v6620_v62 }
  0xf2   : > { %6364 = vmatprep.mubr.msk.f32.mxu0 %vm6723_vm0, %v7914_v2  ;;  %6371 = vmatprep.mubr.msk.f32.mxu1 %vm6723_vm0, %v7914_v2 }
  0xf3   : > { %6622 = vmatprep.subr.bf16.mxu0 %v6729_v8  ;;  %6625 = vmatprep.subr.bf16.mxu1 %v6729_v8  ;;  %v1241_v28 = vpop.permute.xlu1 %1240  ;;  %v1337_v50 = vpop.permute.xlu0 %1336 }
  0xf4   : > { %6365 = vmatmul.mubr.msk.f32.vlgmr.msra.gmra.mrb[8].mxu0 %vm1415_vm4, %v558_v9  ;;  %6372 = vmatmul.mubr.msk.f32.vlgmr.msra.gmra.mrb[8].mxu1 %vm1415_vm4, %v558_v9 }
  0xf5   : > { %6624 = vmatpush3.bf16.msra.mxu0 %v6623_v10  ;;  %6627 = vmatpush3.bf16.msra.mxu1 %v6626_v11 }
  0xf6   : > { %6378 = vmatprep.mubr.msk.f32.mxu0 %vm6723_vm0, %v7914_v2  ;;  %6385 = vmatprep.mubr.msk.f32.mxu1 %vm6723_vm0, %v7914_v2 }
  0xf7   : > { %6628 = vmatprep.subr.bf16.mxu0 %v6729_v8  ;;  %6631 = vmatprep.subr.bf16.mxu1 %v6729_v8  ;;  %v1281_v29 = vpop.permute.xlu1 %1280  ;;  %v7046_v53 = vpop.permute.xlu0 %1344 }
  0xf8   : > { %6379 = vmatmul.mubr.msk.f32.vlgmr.msra.gmra.mrb[10].mxu0 %vm1415_vm4, %v558_v9  ;;  %6386 = vmatmul.mubr.msk.f32.vlgmr.msra.gmra.mrb[10].mxu1 %vm1415_vm4, %v558_v9 }
  0xf9   : > { %6630 = vmatpush3.bf16.msra.mxu0 %v6629_v17  ;;  %6633 = vmatpush3.bf16.msra.mxu1 %v6632_v19 }
  0xfa   : > { %6392 = vmatprep.mubr.msk.f32.mxu0 %vm6723_vm0, %v7914_v2  ;;  %6399 = vmatprep.mubr.msk.f32.mxu1 %vm6723_vm0, %v7914_v2 }
  0xfb   : > { %6634 = vmatprep.subr.bf16.mxu0 %v6729_v8  ;;  %6637 = vmatprep.subr.bf16.mxu1 %v6729_v8  ;;  %v1285_v30 = vpop.permute.xlu1 %1284  ;;  %v1373_v55 = vpop.permute.xlu0 %1372 }
  0xfc   : > { %6393 = vmatmul.mubr.msk.f32.vlgmr.msra.gmra.mrb[12].mxu0 %vm1415_vm4, %v558_v9  ;;  %6400 = vmatmul.mubr.msk.f32.vlgmr.msra.gmra.mrb[12].mxu1 %vm1415_vm4, %v558_v9 }
  0xfd   : > { %6636 = vmatpush3.bf16.msra.mxu0 %v6635_v24  ;;  %6639 = vmatpush3.bf16.msra.mxu1 %v6638_v25 }
  0xfe   : > { %6406 = vmatprep.mubr.msk.f32.mxu0 %vm6723_vm0, %v7914_v2  ;;  %6413 = vmatprep.mubr.msk.f32.mxu1 %vm6723_vm0, %v7914_v2 }
  0xff   : > { %6416 = vmatprep.subr.mxu0 %v7914_v2  ;;  %6421 = vmatprep.subr.mxu1 %v7914_v2  ;;  %v1321_v31 = vpop.permute.xlu1 %1320 }
 0x100   : > { %6407 = vmatmul.mubr.msk.f32.vlgmr.msra.gmra.mrb[14].mxu0 %vm1415_vm4, %v558_v9  ;;  %6414 = vmatmul.mubr.msk.f32.vlgmr.msra.gmra.mrb[14].mxu1 %vm1415_vm4, %v558_v9 }
 0x101   : > { %6418 = vmatprep.mubr.msk.f32.mxu0 %vm6723_vm0, %v7914_v2  ;;  %6423 = vmatprep.mubr.msk.f32.mxu1 %vm6723_vm0, %v7914_v2 }
 0x103   : > { %v1249_v32 = vpop.permute.xlu1 %1248 }
 0x107   : > { %v1289_v33 = vpop.permute.xlu1 %1288 }
 0x10b   : > { %v1253_v34 = vpop.permute.xlu1 %1252 }
 0x10f   : > { %v1333_v35 = vpop.permute.xlu1 %1332 }
 0x113   : > { %v1369_v37 = vpop.permute.xlu1 %1368 }
 0x117   : > { %v7038_v39 = vpop.permute.xlu1 %1256 }
 0x11b   : > { %v7040_v41 = vpop.permute.xlu1 %1296 }
 0x11f   : > { %v1377_v43 = vpop.permute.xlu1 %1376 }
 0x123   : > { %v7044_v45 = vpop.permute.xlu1 %1260 }
 0x127   : > { %v1341_v47 = vpop.permute.xlu1 %1340 }
 0x12b   : > { %v1381_v49 = vpop.permute.xlu1 %1380 }
 0x12f   : > { %v1385_v52 = vpop.permute.xlu1 %1384 }
 0x133   : > { %v7048_v54 = vpop.permute.xlu1 %1348 }
 0x137   : > { %v7062_v17 = vpop.permute.xlu1 %1392 }
 0x1bf   : > { %v7050_v59 = vpop.f32.mrb[4].mxu0  ;;  %v7052_v60 = vpop.f32.mrb[4].mxu1 }
 0x1c0   : > { %v6344_v61 = vpop.f32.mrb[5].mxu0  ;;  %v6349_v62 = vpop.f32.mrb[5].mxu1  ;;  %v1263_v0 = vmul.f32 %v1233_v36, %v7050_v59  ;;  %v1303_v1 = vmul.f32 %v1273_v26, %v7052_v60  ;;  %v1264_v3 = vmul.f32 %v1237_v27, %v7050_v59  ;;  %v1304_v4 = vmul.f32 %v1277_v40, %v7052_v60 }
 0x1c1   : > { %v1265_v8 = vmul.f32 %v1241_v28, %v7050_v59  ;;  %v1305_v9 = vmul.f32 %v1281_v29, %v7052_v60  ;;  %v1266_v10 = vmul.f32 %v1245_v38, %v7050_v59  ;;  %v1306_v11 = vmul.f32 %v1285_v30, %v7052_v60 }
 0x1c2   : > { %v1311_v19 = vadd.f32 %v1303_v1, %v1263_v0  ;;  %v1312_v24 = vadd.f32 %v1304_v4, %v1264_v3  ;;  %v1267_v25 = vmul.f32 %v1249_v32, %v7050_v59  ;;  %v1307_v26 = vmul.f32 %v1289_v33, %v7052_v60 }
 0x1c3   : > { %v1071_v36 = vpop.f32.mrb[6].mxu0  ;;  %v7066_v27 = vpop.f32.mrb[6].mxu1  ;;  %v1313_v40 = vadd.f32 %v1305_v9, %v1265_v8  ;;  %v1314_v61 = vadd.f32 %v1306_v11, %v1266_v10  ;;  %v1268_v28 = vmul.f32 %v1253_v34, %v7050_v59  ;;  %v1308_v29 = vmul.f32 %v1293_v42, %v7052_v60 }
 0x1c4   : > { %v6354_v38 = vpop.f32.mrb[7].mxu0  ;;  %v6359_v62 = vpop.f32.mrb[7].mxu1  ;;  %v1351_v30 = vmul.f32 %v1321_v31, %v1071_v36  ;;  %v1399_v2 = vmul.f32 %v1369_v37, %v7066_v27  ;;  %v1352_v0 = vmul.f32 %v1325_v46, %v1071_v36  ;;  %v1400_v1 = vmul.f32 %v1373_v55, %v7066_v27 }
 0x1c5   : > { %v1353_v32 = vmul.f32 %v1329_v48, %v1071_v36  ;;  %v1401_v33 = vmul.f32 %v1377_v43, %v7066_v27  ;;  %v1354_v3 = vmul.f32 %v1333_v35, %v1071_v36  ;;  %v1402_v4 = vmul.f32 %v1381_v49, %v7066_v27  ;;  %v1389_v8 = vpop.permute.xlu0 %1388 }
 0x1c6   : > { %v1359_v9 = vadd.f32 %v1351_v30, %v1311_v19  ;;  %v1360_v10 = vadd.f32 %v1352_v0, %v1312_v24  ;;  %v1315_v34 = vadd.f32 %v1307_v26, %v1267_v25  ;;  %v1355_v11 = vmul.f32 %v1337_v50, %v1071_v36  ;;  %v1397_v50 = vpop.permute.xlu1 %1396 }
 0x1c7   : > { %v1485_v42 = vpop.f32.mrb[8].mxu0  ;;  %v1555_v38 = vpop.f32.mrb[8].mxu1  ;;  %v1361_v62 = vadd.f32 %v1353_v32, %v1313_v40  ;;  %v1362_v31 = vadd.f32 %v1354_v3, %v1314_v61  ;;  %v1403_v37 = vmul.f32 %v1385_v52, %v7066_v27  ;;  %v1316_v46 = vadd.f32 %v1308_v29, %v1268_v28 }
 0x1c8   : > { %v1407_v18 = vadd.f32 %v1399_v2, %v1359_v9  ;;  %v1408_v55 = vadd.f32 %v1400_v1, %v1360_v10  ;;  %v6366_v48 = vpop.f32.mrb[9].mxu0  ;;  %v6373_v14 = vpop.f32.mrb[9].mxu1  ;;  %v1363_v43 = vadd.f32 %v1355_v11, %v1315_v34  ;;  %v1356_v35 = vmul.f32 %v1341_v47, %v1071_v36 }
 0x1c9   : > { %v1409_v49 = vadd.f32 %v1401_v33, %v1361_v62  ;;  %v1410_v23 = vadd.f32 %v1402_v4, %v1362_v31  ;;  %v1269_v19 = vmul.f32 %v7038_v39, %v7050_v59  ;;  %v1404_v2 = vmul.f32 %v1389_v8, %v7066_v27  ;;  %v1991_v32 = vpop.permute.xlu0 %1990 }
 0x1ca   : > { %v1486_v24 = vadd.f32 %v1485_v42, %v1407_v18  ;;  %v1556_v25 = vadd.f32 %v1555_v38, %v1408_v55  ;;  %v1411_v26 = vadd.f32 %v1403_v37, %v1363_v43  ;;  %v1364_v40 = vadd.f32 %v1356_v35, %v1316_v46 }
 0x1cb   : > { %v1625_v61 = vpop.f32.mrb[10].mxu0  ;;  %v1695_v52 = vpop.f32.mrb[10].mxu1  ;;  %v1309_v14 = vmul.f32 %v7040_v41, %v7052_v60  ;;  %v1357_v47 = vmul.f32 %v7046_v53, %v1071_v36  ;;  %v1270_v28 = vmul.f32 %v7044_v45, %v7050_v59  ;;  %v1310_v4 = vmul.f32 %v7042_v44, %v7052_v60 }
 0x1cc   : > { %v1979_v29 = vmax.f32 %v1486_v24, 0.0  ;;  %v1980_v30 = vmax.f32 %v1556_v25, 0.0  ;;  %v1626_v39 = vadd.f32 %v1625_v61, %v1409_v49  ;;  %v1696_v0 = vadd.f32 %v1695_v52, %v1410_v23  ;;  %v6380_v18 = vpop.f32.mrb[11].mxu0  ;;  %v6387_v1 = vpop.f32.mrb[11].mxu1 }
 0x1cd   : > { %v1412_v33 = vadd.f32 %v1404_v2, %v1364_v40  ;;  %v1317_v3 = vadd.f32 %v1309_v14, %v1269_v19  ;;  %v1358_v8 = vmul.f32 %v7048_v54, %v1071_v36  ;;  %v1405_v23 = vmul.f32 %v7062_v17, %v7066_v27 }
 0x1ce   : > { %v1993_v41 = vmul.f32 %v1991_v32, %v1979_v29  ;;  %v1994_v9 = vmul.f32 %v1991_v32, %v1980_v30  ;;  %v1981_v53 = vmax.f32 %v1626_v39, 0.0  ;;  %v1982_v10 = vmax.f32 %v1696_v0, 0.0 }
 0x1cf   : > { %v1765_v34 = vpop.f32.mrb[12].mxu0  ;;  %v1835_v45 = vpop.f32.mrb[12].mxu1  ;;  %v1365_v59 = vadd.f32 %v1357_v47, %v1317_v3  ;;  %v1318_v11 = vadd.f32 %v1310_v4, %v1270_v28  ;;  %v1406_v42 = vmul.f32 %v1397_v50, %v7066_v27 }
 0x1d0   : > { %v2002_v38 = vsel %vm2001_vm5, %v1993_v41, 0.0  ;;  %v2009_v62 = vsel %vm2001_vm5, %v1994_v9, 0.0  ;;  %v1995_v44 = vmul.f32 %v1991_v32, %v1981_v53  ;;  %v1996_v60 = vmul.f32 %v1991_v32, %v1982_v10  ;;  %v6394_v54 = vpop.f32.mrb[13].mxu0  ;;  %v6401_v36 = vpop.f32.mrb[13].mxu1 }
 0x1d1   : > { %v2003_v31 = vrot.slane %v2002_v38, 4  ;;  %v2010_v37 = vrot.slane %v2009_v62, 4  ;;  %v1766_v46 = vadd.f32 %v1765_v34, %v1411_v26  ;;  %v1836_v55 = vadd.f32 %v1835_v45, %v1412_v33 }
 0x1d2   : > { %v2016_v48 = vsel %vm2001_vm5, %v1995_v44, 0.0  ;;  %v2023_v43 = vsel %vm2001_vm5, %v1996_v60, 0.0  ;;  %v1413_v17 = vadd.f32 %v1405_v23, %v1365_v59  ;;  %v1366_v35 = vadd.f32 %v1358_v8, %v1318_v11 }
 0x1d3   : > { %v2004_v49 = vadd.f32 %v2003_v31, %v2002_v38  ;;  %v2011_v27 = vadd.f32 %v2010_v37, %v2009_v62  ;;  %v2017_v19 = vrot.slane %v2016_v48, 4  ;;  %v2024_v50 = vrot.slane %v2023_v43, 4  ;;  %v1905_v24 = vpop.f32.mrb[14].mxu0  ;;  %v1975_v25 = vpop.f32.mrb[14].mxu1 }
 0x1d4   : > { %v1983_v40 = vmax.f32 %v1766_v46, 0.0  ;;  %v1984_v61 = vmax.f32 %v1836_v55, 0.0  ;;  %v1906_v52 = vadd.f32 %v1905_v24, %v1413_v17  ;;  %v1414_v2 = vadd.f32 %v1406_v42, %v1366_v35  ;;  %v6408_v14 = vpop.f32.mrb[15].mxu0  ;;  %v6415_v47 = vpop.f32.mrb[15].mxu1 }
 0x1d5   : > { %v2005_v26 = vrot.slane %v2004_v49, 2  ;;  %v2012_v28 = vrot.slane %v2011_v27, 2  ;;  %v2018_v29 = vadd.f32 %v2017_v19, %v2016_v48  ;;  %v2025_v30 = vadd.f32 %v2024_v50, %v2023_v43 }
 0x1d6   : > { %v1997_v39 = vmul.f32 %v1991_v32, %v1983_v40  ;;  %v1998_v0 = vmul.f32 %v1991_v32, %v1984_v61  ;;  %v1985_v18 = vmax.f32 %v1906_v52, 0.0  ;;  %v1976_v1 = vadd.f32 %v1975_v25, %v1414_v2 }
 0x1d7   : > { %v2019_v33 = vrot.slane %v2018_v29, 2  ;;  %v2026_v3 = vrot.slane %v2025_v30, 2  ;;  %v2006_v4 = vadd.f32 %v2005_v26, %v2004_v49  ;;  %v2013_v8 = vadd.f32 %v2012_v28, %v2011_v27  ;;  %v2066_v49 = vpop.permute.xlu1 %2065 }
 0x1d8   : > { %v2030_v41 = vsel %vm2001_vm5, %v1997_v39, 0.0  ;;  %v2037_v9 = vsel %vm2001_vm5, %v1998_v0, 0.0  ;;  %v1999_v53 = vmul.f32 %v1991_v32, %v1985_v18  ;;  %v1986_v10 = vmax.f32 %v1976_v1, 0.0 }
 0x1d9   : > { %v2020_v34 = vadd.f32 %v2019_v33, %v2018_v29  ;;  %v2027_v45 = vadd.f32 %v2026_v3, %v2025_v30  ;;  %v2031_v59 = vrot.slane %v2030_v41, 4  ;;  %v2038_v23 = vrot.slane %v2037_v9, 4 }
 0x1da   : > { %v2044_v11 = vsel %vm2001_vm5, %v1999_v53, 0.0  ;;  %v2000_v42 = vmul.f32 %v1991_v32, %v1986_v10  ;;  %v2007_v38 = vrot.slane %v2006_v4, 1  ;;  %v2014_v62 = vrot.slane %v2013_v8, 1 }
 0x1db   : > { %v2021_v44 = vrot.slane %v2020_v34, 1  ;;  %v2028_v60 = vrot.slane %v2027_v45, 1  ;;  %v2032_v54 = vadd.f32 %v2031_v59, %v2030_v41  ;;  %v2039_v36 = vadd.f32 %v2038_v23, %v2037_v9 }
 0x1dc   : > { %v2045_v31 = vrot.slane %v2044_v11, 4  ;;  %v2051_v37 = vsel %vm2001_vm5, %v2000_v42, 0.0  ;;  %v2008_v46 = vadd.f32 %v2007_v38, %v2006_v4  ;;  %v2015_v55 = vadd.f32 %v2014_v62, %v2013_v8 }
 0x1dd   : > { %v2022_v48 = vadd.f32 %v2021_v44, %v2020_v34  ;;  %v2029_v43 = vadd.f32 %v2028_v60, %v2027_v45  ;;  %v2033_v17 = vrot.slane %v2032_v54, 2  ;;  %v2040_v35 = vrot.slane %v2039_v36, 2 }
 0x1de   : > { %v2046_v27 = vadd.f32 %v2045_v31, %v2044_v11  ;;  %v2052_v19 = vrot.slane %v2051_v37, 4  ;;  %v2068_v50 = vadd.f32 %v2066_v49, %v2008_v46  ;;  %v2069_v32 = vadd.f32 %v2066_v49, %v2015_v55 }
 0x1df   : > { %v2034_v24 = vadd.f32 %v2033_v17, %v2032_v54  ;;  %v2041_v25 = vadd.f32 %v2040_v35, %v2039_v36  ;;  %v2070_v40 = vadd.f32 %v2066_v49, %v2022_v48  ;;  %v2071_v61 = vadd.f32 %v2066_v49, %v2029_v43 }
 0x1e0   : > { %v2047_v52 = vrot.slane %v2046_v27, 2  ;;  %v2053_v2 = vadd.f32 %v2052_v19, %v2051_v37  ;;  %v6111_v14 = vmul.f32 -1.442695, %v2068_v50  ;;  %v6112_v47 = vmul.f32 -1.442695, %v2069_v32 }
 0x1e1   : > { %v2035_v26 = vrot.slane %v2034_v24, 1  ;;  %v2042_v28 = vrot.slane %v2041_v25, 1  ;;  %v6113_v29 = vmul.f32 -1.442695, %v2070_v40  ;;  %v6114_v30 = vmul.f32 -1.442695, %v2071_v61 }
 0x1e2   : > { %v2048_v39 = vadd.f32 %v2047_v52, %v2046_v27  ;;  %v2054_v0 = vrot.slane %v2053_v2, 2  ;;  %6680 = vpow2.f32 %v6111_v14 }
 0x1e3   : > { %v2036_v18 = vadd.f32 %v2035_v26, %v2034_v24  ;;  %v2043_v1 = vadd.f32 %v2042_v28, %v2041_v25  ;;  %6682 = vpow2.f32 %v6112_v47 }
 0x1e4   : > { %v2049_v33 = vrot.slane %v2048_v39, 1  ;;  %v2055_v3 = vadd.f32 %v2054_v0, %v2053_v2  ;;  %6684 = vpow2.f32 %v6113_v29  ;;  %v2125_v29 = vld [vmem:[%s7909_s11] sm:$0xff] }
 0x1e5   : > { %v2072_v4 = vadd.f32 %v2066_v49, %v2036_v18  ;;  %v2073_v8 = vadd.f32 %v2066_v49, %v2043_v1  ;;  %6686 = vpow2.f32 %v6114_v30  ;;  %v7112_v0 = vld [vmem:[%s7905_s7] sm:$0xf]  ;;  %v3191_v18 = vrot.slane %v6930_v51, 4 }
 0x1e6   : > { %v2050_v41 = vadd.f32 %v2049_v33, %v2048_v39  ;;  %v2056_v9 = vrot.slane %v2055_v3, 1  ;;  %v7927_v39 = vmov 0.0   ;;  %v3337_v1 = vrot.slane %v6952_v63, 4 }
 0x1e7   : > { %v6115_v53 = vmul.f32 -1.442695, %v2072_v4  ;;  %v6116_v10 = vmul.f32 -1.442695, %v2073_v8  ;;  %v4976_v33 = vrot.slane %v6933_v56, 4 }
 0x1e8   : > { %v2057_v34 = vadd.f32 %v2056_v9, %v2055_v3  ;;  %v2074_v45 = vadd.f32 %v2066_v49, %v2050_v41  ;;  %v5122_v3 = vrot.slane %v6959_v5, 4 }
 0x1e9   : > { %6688 = vpow2.f32 %v6115_v53 }
 0x1ea   : > { %v2075_v59 = vadd.f32 %v2066_v49, %v2057_v34  ;;  %6690 = vpow2.f32 %v6116_v10  ;;  %v6117_v23 = vmul.f32 -1.442695, %v2074_v45  ;;  %v7282_v34 = vld [vmem:[%s7910_s12 + $0x8] sm:$0xff] }
 0x1ec   : > { %v6681_v11 = vpop.eup %6680  ;;  %6692 = vpow2.f32 %v6117_v23  ;;  %v6118_v42 = vmul.f32 -1.442695, %v2075_v59  ;;  %v3264_v23 = vrot.slane %v6936_v57, 4 }
 0x1ed   : > { %v6683_v38 = vpop.eup %6682  ;;  %v2100_v62 = vadd.f32 1.0, %v6681_v11 }
 0x1ee   : > { %v6685_v44 = vpop.eup %6684  ;;  %6694 = vpow2.f32 %v6118_v42  ;;  %v2101_v60 = vadd.f32 1.0, %v6683_v38  ;;  %v3410_v38 = vrot.slane %v6962_v6, 4 }
 0x1ef   : > { %v6687_v54 = vpop.eup %6686  ;;  %v2102_v36 = vadd.f32 1.0, %v6685_v44  ;;  %6696 = vrcp.f32 %v2100_v62  ;;  %v3556_v44 = vrot.slane %v6987_v15, 4 }
 0x1f0   : > { %v2103_v31 = vadd.f32 1.0, %v6687_v54  ;;  %6698 = vrcp.f32 %v2101_v60  ;;  %v3702_v54 = vrot.slane %v7009_v22, 4 }
 0x1f1   : > { %6700 = vrcp.f32 %v2102_v36 }
 0x1f2   : > { %6702 = vrcp.f32 %v2103_v31 }
 0x1f3   : > { %v6689_v37 = vpop.eup %6688 }
 0x1f4   : > { %v6691_v46 = vpop.eup %6690  ;;  %v2104_v55 = vadd.f32 1.0, %v6689_v37 }
 0x1f5   : > { %v2105_v48 = vadd.f32 1.0, %v6691_v46 }
 0x1f6   : > { %v6693_v43 = vpop.eup %6692  ;;  %6704 = vrcp.f32 %v2104_v55 }
 0x1f7   : > { %v2106_v17 = vadd.f32 1.0, %v6693_v43  ;;  %6706 = vrcp.f32 %v2105_v48 }
 0x1f8   : > { %v6695_v35 = vpop.eup %6694 }
 0x1f9   : > { %v6697_v49 = vpop.eup %6696  ;;  %v2107_v27 = vadd.f32 1.0, %v6695_v35  ;;  %6708 = vrcp.f32 %v2106_v17  ;;  %v7928_v35 = vld [vmem:[#allocation5_spill] sm:$0xff] }
 0x1fa   : > { %v6699_v19 = vpop.eup %6698 }
 0x1fb   : > { %v6701_v50 = vpop.eup %6700  ;;  %6710 = vrcp.f32 %v2107_v27  ;;  %v2135_v32 = vsel %vm2134_vm6, %v6699_v19, %v6697_v49  ;;  %v6712_v19 = vld [vmem:[%s6927_s17 + $0x18] sm:$0xff] }
 0x1fc   : > { %v6703_v24 = vpop.eup %6702  ;;  %v2137_v25 = vsel %vm2136_vm7, %v6701_v50, %v2135_v32  ;;  %v5049_v50 = vrot.slane %v6712_v19, 4 }
 0x1fd   : > { %v2139_v40 = vsel %vm2138_vm8, %v6703_v24, %v2137_v25  ;;  %v6713_v25 = vld [vmem:[%s6927_s17 + $0x38] sm:$0xff] }
 0x200   : > { %v6705_v61 = vpop.eup %6704 }
 0x201   : > { %v6707_v52 = vpop.eup %6706  ;;  %v2141_v2 = vsel %vm2140_vm9, %v6705_v61, %v2139_v40  ;;  %v5195_v40 = vrot.slane %v6713_v25, 4  ;;  %v5341_v61 = vrot.slane %v6990_v16, 4 }
 0x202   : > { %v2143_v14 = vsel %vm2142_vm10, %v6707_v52, %v2141_v2  ;;  %v5487_v52 = vrot.slane %v7928_v35, 4 }
 0x203   : > { %v6709_v47 = vpop.eup %6708 }
 0x204   : > { %v2145_v26 = vsel %vm2144_vm11, %v6709_v47, %v2143_v14 }
 0x205   : > { %v6711_v28 = vpop.eup %6710 }
 0x206   : > { %v7100_v30 = vsel %vm2146_vm12, %v6711_v28, %v2145_v26 }
 0x207   : > { %6417 = vmatpush3.msra.mxu0 %v7100_v30 }
 0x208   : > { %6419 = vmatmul.mubr.msk.f32.vlgmr.msra.gmra.mrb[16].mxu0 %vm566_vm1, %v2125_v29  ;;  %6426 = vmatprep.subr.mxu0 %v7927_v39 }
 0x209   : > { %6427 = vmatpush3.msk.msra.mxu0 %vm855_vm2, %v6930_v51  ;;  %6428 = vmatprep.mubr.msk.f32.mxu0 %vm6723_vm0, %v7927_v39  ;;  %v3483_v51 = vrot.slane %v6977_v12, 4 }
 0x20a   : > { %6436 = vmatprep.subr.mxu0 %v7927_v39 }
 0x20c   : > { %6429 = vmatmul.mubr.msk.f32.vlgmr.msra.gmra.mrb[18].mxu0 %vm851_vm3, %v7112_v0 }
 0x20d   : > { %6437 = vmatpush3.msk.msra.mxu0 %vm855_vm2, %v6952_v63  ;;  %6438 = vmatprep.mubr.msk.f32.mxu0 %vm6723_vm0, %v7927_v39  ;;  %v3629_v63 = vrot.slane %v6999_v20, 4 }
 0x20e   : > { %6446 = vmatprep.subr.mxu0 %v7927_v39 }
 0x210   : > { %6439 = vmatmul.mubr.msk.f32.vlgmr.msra.gmra.mrb[20].mxu0 %vm851_vm3, %v7112_v0 }
 0x211   : > { %6447 = vmatpush3.msk.msra.mxu0 %vm855_vm2, %v6977_v12  ;;  %6448 = vmatprep.mubr.msk.f32.mxu0 %vm6723_vm0, %v7927_v39  ;;  %v6156_v12 = vld [vmem:[%s7909_s11 + $0x8] sm:$0xff] }
 0x212   : > { %6456 = vmatprep.subr.mxu0 %v7927_v39 }
 0x214   : > { %6449 = vmatmul.mubr.msk.f32.vlgmr.msra.gmra.mrb[22].mxu0 %vm851_vm3, %v7112_v0 }
 0x215   : > { %6457 = vmatpush3.msk.msra.mxu0 %vm855_vm2, %v6999_v20  ;;  %6458 = vmatprep.mubr.msk.f32.mxu0 %vm6723_vm0, %v7927_v39  ;;  %v7217_v20 = vld [vmem:[%s7910_s12] sm:$0xff] }
 0x216   : > { %6466 = vmatprep.subr.mxu0 %v7927_v39  ;;  %6422 = vmatpush3.msra.mxu1 %v7217_v20 }
 0x217   : > { %6431 = vmatprep.subr.mxu1 %v7927_v39 }
 0x218   : > { %6459 = vmatmul.mubr.msk.f32.vlgmr.msra.gmra.mrb[24].mxu0 %vm851_vm3, %v7112_v0 }
 0x219   : > { %6467 = vmatpush3.msra.mxu0 %v7100_v30  ;;  %6468 = vmatprep.mubr.msk.f32.mxu0 %vm6723_vm0, %v7927_v39 }
 0x21a   : > { %6476 = vmatprep.subr.mxu0 %v7927_v39 }
 0x21c   : > { %6469 = vmatmul.mubr.msk.f32.vlgmr.msra.gmra.mrb[26].mxu0 %vm566_vm1, %v2125_v29 }
 0x21d   : > { %6477 = vmatpush3.msk.msra.mxu0 %vm855_vm2, %v3191_v18  ;;  %6478 = vmatprep.mubr.msk.f32.mxu0 %vm6723_vm0, %v7927_v39 }
 0x21e   : > { %6486 = vmatprep.subr.mxu0 %v7927_v39 }
 0x220   : > { %6479 = vmatmul.mubr.msk.f32.vlgmr.msra.gmra.mrb[28].mxu0 %vm851_vm3, %v7112_v0 }
 0x221   : > { %6487 = vmatpush3.msk.msra.mxu0 %vm855_vm2, %v3337_v1  ;;  %6488 = vmatprep.mubr.msk.f32.mxu0 %vm6723_vm0, %v7927_v39 }
 0x222   : > { %6496 = vmatprep.subr.mxu0 %v7927_v39 }
 0x224   : > { %6489 = vmatmul.mubr.msk.f32.vlgmr.msra.gmra.mrb[30].mxu0 %vm851_vm3, %v7112_v0 }
 0x225   : > { %6497 = vmatpush3.msk.msra.mxu0 %vm855_vm2, %v3483_v51  ;;  %6498 = vmatprep.mubr.msk.f32.mxu0 %vm6723_vm0, %v7927_v39  ;;  %v7929_v51 = vld [vmem:[#allocation3_spill] sm:$0xff] }
 0x226   : > { %6506 = vmatprep.subr.mxu0 %v7927_v39 }
 0x228   : > { %6499 = vmatmul.mubr.msk.f32.vlgmr.msra.gmra.mrb[32].mxu0 %vm851_vm3, %v7112_v0 }
 0x229   : > { %6507 = vmatpush3.msk.msra.mxu0 %vm855_vm2, %v3629_v63  ;;  %6508 = vmatprep.mubr.msk.f32.mxu0 %vm6723_vm0, %v7927_v39 }
 0x22a   : > { %6516 = vmatprep.subr.mxu0 %v7927_v39 }
 0x22c   : > { %6509 = vmatmul.mubr.msk.f32.vlgmr.msra.gmra.mrb[34].mxu0 %vm851_vm3, %v7112_v0 }
 0x22d   : > { %6517 = vmatpush3.msra.mxu0 %v7100_v30  ;;  %6518 = vmatprep.mubr.msk.f32.mxu0 %vm6723_vm0, %v7927_v39 }
 0x22e   : > { %6526 = vmatprep.subr.mxu0 %v7927_v39 }
 0x230   : > { %6519 = vmatmul.mubr.msk.f32.vlgmr.msra.gmra.mrb[36].mxu0 %vm566_vm1, %v6156_v12 }
 0x231   : > { %6527 = vmatpush3.msk.msra.mxu0 %vm855_vm2, %v6933_v56  ;;  %6528 = vmatprep.mubr.msk.f32.mxu0 %vm6723_vm0, %v7927_v39  ;;  %v5268_v56 = vrot.slane %v6984_v13, 4 }
 0x232   : > { %6536 = vmatprep.subr.mxu0 %v7927_v39 }
 0x234   : > { %6529 = vmatmul.mubr.msk.f32.vlgmr.msra.gmra.mrb[38].mxu0 %vm851_vm3, %v7112_v0 }
 0x235   : > { %6537 = vmatpush3.msk.msra.mxu0 %vm855_vm2, %v6959_v5  ;;  %6538 = vmatprep.mubr.msk.f32.mxu0 %vm6723_vm0, %v7927_v39  ;;  %v5414_v5 = vrot.slane %v7006_v21, 4 }
 0x236   : > { %6546 = vmatprep.subr.mxu0 %v7927_v39 }
 0x238   : > { %6539 = vmatmul.mubr.msk.f32.vlgmr.msra.gmra.mrb[40].mxu0 %vm851_vm3, %v7112_v0 }
 0x239   : > { %6547 = vmatpush3.msk.msra.mxu0 %vm855_vm2, %v6984_v13  ;;  %6548 = vmatprep.mubr.msk.f32.mxu0 %vm6723_vm0, %v7927_v39 }
 0x23a   : > { %6556 = vmatprep.subr.mxu0 %v7927_v39 }
 0x23c   : > { %6549 = vmatmul.mubr.msk.f32.vlgmr.msra.gmra.mrb[42].mxu0 %vm851_vm3, %v7112_v0 }
 0x23d   : > { %6557 = vmatpush3.msk.msra.mxu0 %vm855_vm2, %v7006_v21  ;;  %6558 = vmatprep.mubr.msk.f32.mxu0 %vm6723_vm0, %v7927_v39 }
 0x23e   : > { %6566 = vmatprep.subr.mxu0 %v7927_v39 }
 0x240   : > { %6559 = vmatmul.mubr.msk.f32.vlgmr.msra.gmra.mrb[44].mxu0 %vm851_vm3, %v7112_v0 }
 0x241   : > { %6567 = vmatpush3.msra.mxu0 %v7100_v30  ;;  %6568 = vmatprep.mubr.msk.f32.mxu0 %vm6723_vm0, %v7927_v39 }
 0x242   : > { %6576 = vmatprep.subr.mxu0 %v7927_v39 }
 0x244   : > { %6569 = vmatmul.mubr.msk.f32.vlgmr.msra.gmra.mrb[46].mxu0 %vm566_vm1, %v6156_v12 }
 0x245   : > { %6578 = vmatprep.mubr.msk.f32.mxu0 %vm6723_vm0, %v7927_v39  ;;  %6577 = vmatpush3.msk.msra.mxu0 %vm855_vm2, %v4976_v33 }
 0x246   : > { %6586 = vmatprep.subr.mxu0 %v7927_v39 }
 0x248   : > { %6579 = vmatmul.mubr.msk.f32.vlgmr.msra.gmra.mrb[48].mxu0 %vm851_vm3, %v7112_v0 }
 0x249   : > { %6588 = vmatprep.mubr.msk.f32.mxu0 %vm6723_vm0, %v7927_v39  ;;  %6587 = vmatpush3.msk.msra.mxu0 %vm855_vm2, %v5122_v3 }
 0x24a   : > { %6596 = vmatprep.subr.mxu0 %v7927_v39 }
 0x24c   : > { %6589 = vmatmul.mubr.msk.f32.vlgmr.msra.gmra.mrb[50].mxu0 %vm851_vm3, %v7112_v0 }
 0x24d   : > { %6598 = vmatprep.mubr.msk.f32.mxu0 %vm6723_vm0, %v7927_v39  ;;  %6597 = vmatpush3.msk.msra.mxu0 %vm855_vm2, %v5268_v56 }
 0x24e   : > { %6606 = vmatprep.subr.mxu0 %v7927_v39 }
 0x250   : > { %6599 = vmatmul.mubr.msk.f32.vlgmr.msra.gmra.mrb[52].mxu0 %vm851_vm3, %v7112_v0 }
 0x251   : > { %6608 = vmatprep.mubr.msk.f32.mxu0 %vm6723_vm0, %v7927_v39  ;;  %6607 = vmatpush3.msk.msra.mxu0 %vm855_vm2, %v5414_v5 }
 0x254   : > { %6609 = vmatmul.mubr.msk.f32.vlgmr.msra.gmra.mrb[54].mxu0 %vm851_vm3, %v7112_v0 }
 0x2db   : > { %v2218_v13 = vpop.f32.mrb[16].mxu0 }
 0x2dc   : > { %6424 = vmatmul.mubr.msk.f32.vlgmr.msra.gmra.mrb[16].mxu1 %vm566_vm1, %v2218_v13  ;;  %v6420_v4 = vpop.f32.mrb[17].mxu0  ;;  %v7930_v13 = vld [vmem:[#allocation4_spill] sm:$0xff] }
 0x2dd   : > { %6432 = vmatpush3.msk.msra.mxu1 %vm855_vm2, %v6936_v57  ;;  %6433 = vmatprep.mubr.msk.f32.mxu1 %vm6723_vm0, %v7927_v39 }
 0x2de   : > { %6441 = vmatprep.subr.mxu1 %v7927_v39 }
 0x2df   : > { %v7252_v21 = vpop.f32.mrb[18].mxu0 }
 0x2e0   : > { %6434 = vmatmul.mubr.msk.f32.vlgmr.msra.gmra.mrb[18].mxu1 %vm851_vm3, %v7112_v0  ;;  %v6430_v8 = vpop.f32.mrb[19].mxu0 }
 0x2e1   : > { %6442 = vmatpush3.msk.msra.mxu1 %vm855_vm2, %v6962_v6  ;;  %6443 = vmatprep.mubr.msk.f32.mxu1 %vm6723_vm0, %v7927_v39 }
 0x2e2   : > { %6451 = vmatprep.subr.mxu1 %v7927_v39 }
 0x2e3   : > { %v7261_v41 = vpop.f32.mrb[20].mxu0 }
 0x2e4   : > { %6444 = vmatmul.mubr.msk.f32.vlgmr.msra.gmra.mrb[20].mxu1 %vm851_vm3, %v7112_v0  ;;  %v6440_v9 = vpop.f32.mrb[21].mxu0 }
 0x2e5   : > { %6452 = vmatpush3.msk.msra.mxu1 %vm855_vm2, %v6987_v15  ;;  %6453 = vmatprep.mubr.msk.f32.mxu1 %vm6723_vm0, %v7927_v39 }
 0x2e6   : > { %6461 = vmatprep.subr.mxu1 %v7927_v39 }
 0x2e7   : > { %v7270_v53 = vpop.f32.mrb[22].mxu0 }
 0x2e8   : > { %6454 = vmatmul.mubr.msk.f32.vlgmr.msra.gmra.mrb[22].mxu1 %vm851_vm3, %v7112_v0  ;;  %v6450_v10 = vpop.f32.mrb[23].mxu0 }
 0x2e9   : > { %6462 = vmatpush3.msk.msra.mxu1 %vm855_vm2, %v7009_v22  ;;  %6463 = vmatprep.mubr.msk.f32.mxu1 %vm6723_vm0, %v7927_v39 }
 0x2ea   : > { %6471 = vmatprep.subr.mxu1 %v7927_v39 }
 0x2eb   : > { %v7284_v45 = vpop.f32.mrb[24].mxu0 }
 0x2ec   : > { %6464 = vmatmul.mubr.msk.f32.vlgmr.msra.gmra.mrb[24].mxu1 %vm851_vm3, %v7112_v0  ;;  %v6460_v59 = vpop.f32.mrb[25].mxu0 }
 0x2ed   : > { %6472 = vmatpush3.msra.mxu1 %v7282_v34  ;;  %6473 = vmatprep.mubr.msk.f32.mxu1 %vm6723_vm0, %v7927_v39 }
 0x2ee   : > { %6481 = vmatprep.subr.mxu1 %v7927_v39 }
 0x2ef   : > { %v3112_v11 = vpop.f32.mrb[26].mxu0 }
 0x2f0   : > { %6474 = vmatmul.mubr.msk.f32.vlgmr.msra.gmra.mrb[26].mxu1 %vm566_vm1, %v3112_v11  ;;  %v6470_v42 = vpop.f32.mrb[27].mxu0 }
 0x2f1   : > { %6482 = vmatpush3.msk.msra.mxu1 %vm855_vm2, %v3264_v23  ;;  %6483 = vmatprep.mubr.msk.f32.mxu1 %vm6723_vm0, %v7927_v39 }
 0x2f2   : > { %6491 = vmatprep.subr.mxu1 %v7927_v39 }
 0x2f3   : > { %v7299_v62 = vpop.f32.mrb[28].mxu0 }
 0x2f4   : > { %6484 = vmatmul.mubr.msk.f32.vlgmr.msra.gmra.mrb[28].mxu1 %vm851_vm3, %v7112_v0  ;;  %v6480_v57 = vpop.f32.mrb[29].mxu0 }
 0x2f5   : > { %6492 = vmatpush3.msk.msra.mxu1 %vm855_vm2, %v3410_v38  ;;  %6493 = vmatprep.mubr.msk.f32.mxu1 %vm6723_vm0, %v7927_v39 }
 0x2f6   : > { %6501 = vmatprep.subr.mxu1 %v7927_v39 }
 0x2f7   : > { %v7308_v60 = vpop.f32.mrb[30].mxu0 }
 0x2f8   : > { %6494 = vmatmul.mubr.msk.f32.vlgmr.msra.gmra.mrb[30].mxu1 %vm851_vm3, %v7112_v0  ;;  %v6490_v6 = vpop.f32.mrb[31].mxu0 }
 0x2f9   : > { %6502 = vmatpush3.msk.msra.mxu1 %vm855_vm2, %v3556_v44  ;;  %6503 = vmatprep.mubr.msk.f32.mxu1 %vm6723_vm0, %v7927_v39  ;;  %v2985_v44 = vpop.permute.xlu1 %2984 }
 0x2fa   : > { %6511 = vmatprep.subr.mxu1 %v7927_v39 }
 0x2fb   : > { %v7317_v36 = vpop.f32.mrb[32].mxu0 }
 0x2fc   : > { %6504 = vmatmul.mubr.msk.f32.vlgmr.msra.gmra.mrb[32].mxu1 %vm851_vm3, %v7112_v0  ;;  %v6500_v15 = vpop.f32.mrb[33].mxu0 }
 0x2fd   : > { %6512 = vmatpush3.msk.msra.mxu1 %vm855_vm2, %v3702_v54  ;;  %6513 = vmatprep.mubr.msk.f32.mxu1 %vm6723_vm0, %v7927_v39 }
 0x2fe   : > { %6521 = vmatprep.subr.mxu1 %v7927_v39 }
 0x2ff   : > { %v7325_v31 = vpop.f32.mrb[34].mxu0 }
 0x300   : > { %6514 = vmatmul.mubr.msk.f32.vlgmr.msra.gmra.mrb[34].mxu1 %vm851_vm3, %v7112_v0  ;;  %v6510_v22 = vpop.f32.mrb[35].mxu0 }
 0x301   : > { %6522 = vmatpush3.msra.mxu1 %v7217_v20  ;;  %6523 = vmatprep.mubr.msk.f32.mxu1 %vm6723_vm0, %v7927_v39 }
 0x302   : > { %6531 = vmatprep.subr.mxu1 %v7927_v39 }
 0x303   : > { %v4006_v37 = vpop.f32.mrb[36].mxu0 }
 0x304   : > { %6524 = vmatmul.mubr.msk.f32.vlgmr.msra.gmra.mrb[36].mxu1 %vm566_vm1, %v4006_v37  ;;  %v6520_v46 = vpop.f32.mrb[37].mxu0 }
 0x305   : > { %6532 = vmatpush3.msk.msra.mxu1 %vm855_vm2, %v6939_v58  ;;  %6533 = vmatprep.mubr.msk.f32.mxu1 %vm6723_vm0, %v7927_v39 }
 0x306   : > { %6541 = vmatprep.subr.mxu1 %v7927_v39 }
 0x307   : > { %v7339_v55 = vpop.f32.mrb[38].mxu0 }
 0x308   : > { %6534 = vmatmul.mubr.msk.f32.vlgmr.msra.gmra.mrb[38].mxu1 %vm851_vm3, %v7112_v0  ;;  %v6530_v48 = vpop.f32.mrb[39].mxu0 }
 0x309   : > { %6542 = vmatpush3.msk.msra.mxu1 %vm855_vm2, %v6965_v7  ;;  %6543 = vmatprep.mubr.msk.f32.mxu1 %vm6723_vm0, %v7927_v39 }
 0x30a   : > { %6551 = vmatprep.subr.mxu1 %v7927_v39 }
 0x30b   : > { %v7348_v58 = vpop.f32.mrb[40].mxu0 }
 0x30c   : > { %6544 = vmatmul.mubr.msk.f32.vlgmr.msra.gmra.mrb[40].mxu1 %vm851_vm3, %v7112_v0  ;;  %v6540_v43 = vpop.f32.mrb[41].mxu0 }
 0x30d   : > { %6552 = vmatpush3.msk.msra.mxu1 %vm855_vm2, %v6990_v16  ;;  %6553 = vmatprep.mubr.msk.f32.mxu1 %vm6723_vm0, %v7927_v39 }
 0x30e   : > { %6561 = vmatprep.subr.mxu1 %v7927_v39 }
 0x30f   : > { %v7357_v7 = vpop.f32.mrb[42].mxu0 }
 0x310   : > { %6554 = vmatmul.mubr.msk.f32.vlgmr.msra.gmra.mrb[42].mxu1 %vm851_vm3, %v7112_v0  ;;  %v6550_v17 = vpop.f32.mrb[43].mxu0 }
 0x311   : > { %6562 = vmatpush3.msk.msra.mxu1 %vm855_vm2, %v7928_v35  ;;  %6563 = vmatprep.mubr.msk.f32.mxu1 %vm6723_vm0, %v7927_v39 }
 0x312   : > { %6571 = vmatprep.subr.mxu1 %v7927_v39 }
 0x313   : > { %v7366_v49 = vpop.f32.mrb[44].mxu0 }
 0x314   : > { %6564 = vmatmul.mubr.msk.f32.vlgmr.msra.gmra.mrb[44].mxu1 %vm851_vm3, %v7112_v0  ;;  %v6560_v27 = vpop.f32.mrb[45].mxu0 }
 0x315   : > { %6572 = vmatpush3.msra.mxu1 %v7282_v34  ;;  %6573 = vmatprep.mubr.msk.f32.mxu1 %vm6723_vm0, %v7927_v39 }
 0x316   : > { %6581 = vmatprep.subr.mxu1 %v7927_v39 }
 0x317   : > { %v4898_v32 = vpop.f32.mrb[46].mxu0 }
 0x318   : > { %6574 = vmatmul.mubr.msk.f32.vlgmr.msra.gmra.mrb[46].mxu1 %vm566_vm1, %v4898_v32  ;;  %v6570_v24 = vpop.f32.mrb[47].mxu0 }
 0x319   : > { %6582 = vmatpush3.msk.msra.mxu1 %vm855_vm2, %v5049_v50  ;;  %6583 = vmatprep.mubr.msk.f32.mxu1 %vm6723_vm0, %v7927_v39 }
 0x31a   : > { %6591 = vmatprep.subr.mxu1 %v7927_v39 }
 0x31b   : > { %v7402_v16 = vpop.f32.mrb[48].mxu0 }
 0x31c   : > { %6584 = vmatmul.mubr.msk.f32.vlgmr.msra.gmra.mrb[48].mxu1 %vm851_vm3, %v7112_v0  ;;  %v6580_v2 = vpop.f32.mrb[49].mxu0 }
 0x31d   : > { %6592 = vmatpush3.msk.msra.mxu1 %vm855_vm2, %v5195_v40  ;;  %6593 = vmatprep.mubr.msk.f32.mxu1 %vm6723_vm0, %v7927_v39 }
 0x31e   : > { %6601 = vmatprep.subr.mxu1 %v7927_v39 }
 0x31f   : > { %v7404_v14 = vpop.f32.mrb[50].mxu0 }
 0x320   : > { %6594 = vmatmul.mubr.msk.f32.vlgmr.msra.gmra.mrb[50].mxu1 %vm851_vm3, %v7112_v0  ;;  %v6590_v47 = vpop.f32.mrb[51].mxu0 }
 0x321   : > { %6602 = vmatpush3.msk.msra.mxu1 %vm855_vm2, %v5341_v61  ;;  %6603 = vmatprep.mubr.msk.f32.mxu1 %vm6723_vm0, %v7927_v39 }
 0x322   : > { %6611 = vmatprep.subr.mxu1 %v7927_v39 }
 0x323   : > { %v7406_v26 = vpop.f32.mrb[52].mxu0 }
 0x324   : > { %6604 = vmatmul.mubr.msk.f32.vlgmr.msra.gmra.mrb[52].mxu1 %vm851_vm3, %v7112_v0  ;;  %v6600_v28 = vpop.f32.mrb[53].mxu0 }
 0x325   : > { %6612 = vmatpush3.msk.msra.mxu1 %vm855_vm2, %v5487_v52  ;;  %6613 = vmatprep.mubr.msk.f32.mxu1 %vm6723_vm0, %v7927_v39 }
 0x327   : > { %v7408_v29 = vpop.f32.mrb[54].mxu0 }
 0x328   : > { %6614 = vmatmul.mubr.msk.f32.vlgmr.msra.gmra.mrb[54].mxu1 %vm851_vm3, %v7112_v0  ;;  %v6610_v30 = vpop.f32.mrb[55].mxu0 }
 0x3af   : > { %v2292_v18 = vpop.f32.mrb[16].mxu1 }
 0x3b0   : > { %v2884_v1 = vcombine.high %v2292_v18, %v2292_v18  ;;  %v2891_v63 = vrot.slane %v2292_v18, %v7929_v51  ;;  %v6425_v39 = vpop.f32.mrb[17].mxu1 }
 0x3b2   : > { %v2898_v12 = vrot.slane %v2884_v1, %v7929_v51  ;;  %v2899_v0 = vcombine.high %v2891_v63, %v2891_v63  ;;  %v2907_v20 = vrot.slane %v2891_v63, %v7929_v51 }
 0x3b3   : > { %v2441_v33 = vpop.f32.mrb[18].mxu1 }
 0x3b4   : > { %v2900_v3 = vcombine.high %v2898_v12, %v2898_v12  ;;  %v2914_v56 = vrot.slane %v2898_v12, %v7929_v51  ;;  %v2929_v5 = vcombine.high %v2907_v20, %v2907_v20  ;;  %v2936_v4 = vrot.slane %v2907_v20, %v7930_v13  ;;  %v6435_v8 = vpop.f32.mrb[19].mxu1 }
 0x3b5   : > { %v2921_v9 = vrot.slane %v2899_v0, %v7929_v51 }
 0x3b6   : > { %v2930_v10 = vcombine.high %v2914_v56, %v2914_v56  ;;  %v2944_v34 = vrot.slane %v2929_v5, %v7930_v13  ;;  %v2952_v59 = vrot.slane %v2914_v56, %v7930_v13  ;;  %v2928_v23 = vrot.slane %v2900_v3, %v7929_v51 }
 0x3b7   : > { %v2940_v11 = vrot.slane %v2921_v9, %v7930_v13  ;;  %v2587_v42 = vpop.f32.mrb[20].mxu1  ;;  %v2931_v38 = vcombine.high %v2921_v9, %v2921_v9  ;;  %v2973_v57 = vmul.f32 %v2936_v4, %v7252_v21 }
 0x3b8   : > { %v6445_v6 = vpop.f32.mrb[21].mxu1  ;;  %v2975_v54 = vmul.f32 %v2944_v34, %v7261_v41  ;;  %v2977_v15 = vmul.f32 %v2952_v59, %v7270_v53  ;;  %v2960_v21 = vrot.slane %v2930_v10, %v7930_v13  ;;  %v2956_v48 = vrot.slane %v2928_v23, %v7930_v13 }
 0x3b9   : > { %v2974_v22 = vmul.f32 %v2940_v11, %v2441_v33  ;;  %v2948_v37 = vrot.slane %v2931_v38, %v7930_v13  ;;  %v7431_v46 = vadd.f32 %v2985_v44, %v2973_v57  ;;  %v2932_v43 = vcombine.high %v2928_v23, %v2928_v23 }
 0x3ba   : > { %v7435_v17 = vadd.f32 %v2985_v44, %v2975_v54  ;;  %v7437_v35 = vadd.f32 %v2985_v44, %v2977_v15  ;;  %v2979_v50 = vmul.f32 %v2960_v21, %v7284_v45  ;;  %v3877_v21 = vpop.permute.xlu0 %3876 }
 0x3bb   : > { %v7439_v41 = vadd.f32 %v2985_v44, %v2974_v22  ;;  %v2976_v53 = vmul.f32 %v2948_v37, %v2587_v42  ;;  %v2733_v27 = vpop.f32.mrb[22].mxu1  ;;  %v3003_v19 = vsel %vm2001_vm5, %v7431_v46, 0.0  ;;  %2995 = vst.msk [vmem:[%s7426_s19] sm:$0xf] %vm2001_vm5, %v7431_v46  ;;  %v2964_v52 = vrot.slane %v2932_v43, %v7930_v13 }
 0x3bc   : > { %v2978_v32 = vmul.f32 %v2956_v48, %v2733_v27  ;;  %3004 = vadd.xlane.f32.xlu1 %v3003_v19  ;;  %v6455_v24 = vpop.f32.mrb[23].mxu1  ;;  %2997 = vst.msk [vmem:[%s7426_s19 + $0x20] sm:$0xf] %vm2001_vm5, %v7435_v17  ;;  %2999 = vst.msk [vmem:[%s7426_s19 + $0x40] sm:$0xf] %vm2001_vm5, %v7437_v35  ;;  %v7460_v45 = vadd.f32 %v2985_v44, %v2979_v50  ;;  %v3009_v18 = vsel %vm2001_vm5, %v7435_v17, 0.0 }
 0x3bd   : > { %2996 = vst.msk [vmem:[%s7426_s19 + $0x10] sm:$0xf] %vm2001_vm5, %v7439_v41  ;;  %v7456_v25 = vadd.f32 %v2985_v44, %v2976_v53  ;;  %v3006_v40 = vsel %vm2001_vm5, %v7439_v41, 0.0  ;;  %v3015_v33 = vsel %vm2001_vm5, %v7437_v35, 0.0 }
 0x3be   : > { %v7462_v61 = vadd.f32 %v2985_v44, %v2978_v32  ;;  %3007 = vadd.xlane.f32.xlu0 %v3006_v40  ;;  %3001 = vst.msk [vmem:[%s7426_s19 + $0x60] sm:$0xf] %vm2001_vm5, %v7460_v45  ;;  %v3021_v11 = vsel %vm2001_vm5, %v7460_v45, 0.0 }
 0x3bf   : > { %2998 = vst.msk [vmem:[%s7426_s19 + $0x30] sm:$0xf] %vm2001_vm5, %v7456_v25  ;;  %v2879_v2 = vpop.f32.mrb[24].mxu1  ;;  %v3012_v47 = vsel %vm2001_vm5, %v7456_v25, 0.0 }
 0x3c0   : > { %3000 = vst.msk [vmem:[%s7426_s19 + $0x50] sm:$0xf] %vm2001_vm5, %v7462_v61  ;;  %v2980_v28 = vmul.f32 %v2964_v52, %v2879_v2  ;;  %3013 = vadd.xlane.f32.xlu1 %v3012_v47  ;;  %v6465_v30 = vpop.f32.mrb[25].mxu1  ;;  %v3018_v63 = vsel %vm2001_vm5, %v7462_v61, 0.0 }
 0x3c2   : > { %v7478_v1 = vadd.f32 %v2985_v44, %v2980_v28  ;;  %3010 = vadd.xlane.f32.xlu0 %v3009_v18 }
 0x3c3   : > { %v3187_v39 = vpop.f32.mrb[26].mxu1 }
 0x3c4   : > { %3002 = vst.msk [vmem:[%s7426_s19 + $0x70] sm:$0xf] %vm2001_vm5, %v7478_v1  ;;  %3019 = vadd.xlane.f32.xlu1 %v3018_v63  ;;  %v3776_v12 = vcombine.high %v3187_v39, %v3187_v39  ;;  %v3783_v0 = vrot.slane %v3187_v39, %v7929_v51  ;;  %v6475_v20 = vpop.f32.mrb[27].mxu1  ;;  %v3024_v4 = vsel %vm2001_vm5, %v7478_v1, 0.0 }
 0x3c6   : > { %v3790_v3 = vrot.slane %v3776_v12, %v7929_v51  ;;  %v3791_v56 = vcombine.high %v3783_v0, %v3783_v0  ;;  %v3799_v5 = vrot.slane %v3783_v0, %v7929_v51  ;;  %3016 = vadd.xlane.f32.xlu0 %v3015_v33 }
 0x3c7   : > { %v3333_v8 = vpop.f32.mrb[28].mxu1 }
 0x3c8   : > { %v3792_v9 = vcombine.high %v3790_v3, %v3790_v3  ;;  %v3806_v10 = vrot.slane %v3790_v3, %v7929_v51  ;;  %v3821_v34 = vcombine.high %v3799_v5, %v3799_v5  ;;  %v3828_v59 = vrot.slane %v3799_v5, %v7930_v13  ;;  %3025 = vadd.xlane.f32.xlu1 %v3024_v4  ;;  %v6485_v23 = vpop.f32.mrb[29].mxu1 }
 0x3c9   : > { %v3813_v42 = vrot.slane %v3791_v56, %v7929_v51 }
 0x3ca   : > { %v3822_v38 = vcombine.high %v3806_v10, %v3806_v10  ;;  %v3836_v57 = vrot.slane %v3821_v34, %v7930_v13  ;;  %v3844_v44 = vrot.slane %v3806_v10, %v7930_v13  ;;  %3022 = vadd.xlane.f32.xlu0 %v3021_v11  ;;  %v3820_v6 = vrot.slane %v3792_v9, %v7929_v51 }
 0x3cb   : > { %v3832_v54 = vrot.slane %v3813_v42, %v7930_v13  ;;  %v3479_v15 = vpop.f32.mrb[30].mxu1  ;;  %v3823_v22 = vcombine.high %v3813_v42, %v3813_v42  ;;  %v3865_v37 = vmul.f32 %v3828_v59, %v7299_v62 }
 0x3cc   : > { %v6495_v48 = vpop.f32.mrb[31].mxu1  ;;  %v3867_v43 = vmul.f32 %v3836_v57, %v7308_v60  ;;  %v3869_v53 = vmul.f32 %v3844_v44, %v7317_v36  ;;  %v3852_v32 = vrot.slane %v3822_v38, %v7930_v13  ;;  %v3848_v24 = vrot.slane %v3820_v6, %v7930_v13 }
 0x3cd   : > { %v3866_v27 = vmul.f32 %v3832_v54, %v3333_v8  ;;  %v3840_v19 = vrot.slane %v3823_v22, %v7930_v13  ;;  %v7505_v50 = vadd.f32 %v3877_v21, %v3865_v37  ;;  %v3824_v62 = vcombine.high %v3820_v6, %v3820_v6 }
 0x3ce   : > { %v7509_v40 = vadd.f32 %v3877_v21, %v3867_v43  ;;  %v7511_v52 = vadd.f32 %v3877_v21, %v3869_v53  ;;  %v3871_v28 = vmul.f32 %v3852_v32, %v7325_v31 }
 0x3cf   : > { %v7513_v60 = vadd.f32 %v3877_v21, %v3866_v27  ;;  %v3868_v36 = vmul.f32 %v3840_v19, %v3479_v15  ;;  %v3625_v2 = vpop.f32.mrb[32].mxu1  ;;  %v3895_v47 = vsel %vm2001_vm5, %v7505_v50, 0.0  ;;  %3887 = vst.msk [vmem:[%s7426_s19 + $0x4] sm:$0xf] %vm2001_vm5, %v7505_v50  ;;  %v3856_v0 = vrot.slane %v3824_v62, %v7930_v13 }
 0x3d0   : > { %v3870_v30 = vmul.f32 %v3848_v24, %v3625_v2  ;;  %3896 = vadd.xlane.f32.xlu0 %v3895_v47  ;;  %v6505_v18 = vpop.f32.mrb[33].mxu1  ;;  %3889 = vst.msk [vmem:[%s7426_s19 + $0x24] sm:$0xf] %vm2001_vm5, %v7509_v40  ;;  %3891 = vst.msk [vmem:[%s7426_s19 + $0x44] sm:$0xf] %vm2001_vm5, %v7511_v52  ;;  %v7534_v31 = vadd.f32 %v3877_v21, %v3871_v28  ;;  %v3901_v33 = vsel %vm2001_vm5, %v7509_v40, 0.0  ;;  %v4770_v2 = vpop.permute.xlu1 %4769 }
 0x3d1   : > { %3888 = vst.msk [vmem:[%s7426_s19 + $0x14] sm:$0xf] %vm2001_vm5, %v7513_v60  ;;  %v7530_v63 = vadd.f32 %v3877_v21, %v3868_v36  ;;  %v3898_v39 = vsel %vm2001_vm5, %v7513_v60, 0.0  ;;  %v3907_v8 = vsel %vm2001_vm5, %v7511_v52, 0.0 }
 0x3d2   : > { %v7536_v12 = vadd.f32 %v3877_v21, %v3870_v30  ;;  %3899 = vadd.xlane.f32.xlu1 %v3898_v39  ;;  %3893 = vst.msk [vmem:[%s7426_s19 + $0x64] sm:$0xf] %vm2001_vm5, %v7534_v31  ;;  %v3913_v57 = vsel %vm2001_vm5, %v7534_v31, 0.0 }
 0x3d3   : > { %3890 = vst.msk [vmem:[%s7426_s19 + $0x34] sm:$0xf] %vm2001_vm5, %v7530_v63  ;;  %v3771_v20 = vpop.f32.mrb[34].mxu1  ;;  %v3904_v5 = vsel %vm2001_vm5, %v7530_v63, 0.0 }
 0x3d4   : > { %3892 = vst.msk [vmem:[%s7426_s19 + $0x54] sm:$0xf] %vm2001_vm5, %v7536_v12  ;;  %v3872_v3 = vmul.f32 %v3856_v0, %v3771_v20  ;;  %3902 = vadd.xlane.f32.xlu0 %v3901_v33  ;;  %v6515_v56 = vpop.f32.mrb[35].mxu1  ;;  %v3910_v23 = vsel %vm2001_vm5, %v7536_v12, 0.0 }
 0x3d6   : > { %v7552_v4 = vadd.f32 %v3877_v21, %v3872_v3  ;;  %3905 = vadd.xlane.f32.xlu1 %v3904_v5 }
 0x3d7   : > { %v4080_v9 = vpop.f32.mrb[36].mxu1 }
 0x3d8   : > { %3894 = vst.msk [vmem:[%s7426_s19 + $0x74] sm:$0xf] %vm2001_vm5, %v7552_v4  ;;  %3908 = vadd.xlane.f32.xlu0 %v3907_v8  ;;  %v4669_v10 = vcombine.high %v4080_v9, %v4080_v9  ;;  %v4676_v34 = vrot.slane %v4080_v9, %v7929_v51  ;;  %v6525_v59 = vpop.f32.mrb[37].mxu1  ;;  %v3916_v21 = vsel %vm2001_vm5, %v7552_v4, 0.0 }
 0x3da   : > { %v4683_v11 = vrot.slane %v4669_v10, %v7929_v51  ;;  %v4684_v42 = vcombine.high %v4676_v34, %v4676_v34  ;;  %v4692_v38 = vrot.slane %v4676_v34, %v7929_v51  ;;  %3911 = vadd.xlane.f32.xlu1 %v3910_v23 }
 0x3db   : > { %v4226_v44 = vpop.f32.mrb[38].mxu1 }
 0x3dc   : > { %v4685_v6 = vcombine.high %v4683_v11, %v4683_v11  ;;  %v4699_v54 = vrot.slane %v4683_v11, %v7929_v51  ;;  %v4714_v15 = vcombine.high %v4692_v38, %v4692_v38  ;;  %v4721_v22 = vrot.slane %v4692_v38, %v7930_v13  ;;  %3914 = vadd.xlane.f32.xlu0 %v3913_v57  ;;  %v6535_v37 = vpop.f32.mrb[39].mxu1 }
 0x3dd   : > { %v4706_v48 = vrot.slane %v4684_v42, %v7929_v51 }
 0x3de   : > { %v4715_v43 = vcombine.high %v4699_v54, %v4699_v54  ;;  %v4729_v53 = vrot.slane %v4714_v15, %v7930_v13  ;;  %v4737_v27 = vrot.slane %v4699_v54, %v7930_v13  ;;  %3917 = vadd.xlane.f32.xlu1 %v3916_v21  ;;  %v4713_v19 = vrot.slane %v4685_v6, %v7929_v51 }
 0x3df   : > { %v4725_v32 = vrot.slane %v4706_v48, %v7930_v13  ;;  %v4372_v24 = vpop.f32.mrb[40].mxu1  ;;  %v4716_v62 = vcombine.high %v4706_v48, %v4706_v48  ;;  %v4758_v36 = vmul.f32 %v4721_v22, %v7339_v55 }
 0x3e0   : > { %v6545_v47 = vpop.f32.mrb[41].mxu1  ;;  %v4760_v28 = vmul.f32 %v4729_v53, %v7348_v58  ;;  %v4762_v30 = vmul.f32 %v4737_v27, %v7357_v7  ;;  %v4745_v20 = vrot.slane %v4715_v43, %v7930_v13  ;;  %v4741_v33 = vrot.slane %v4713_v19, %v7930_v13 }
 0x3e1   : > { %v4759_v18 = vmul.f32 %v4725_v32, %v4226_v44  ;;  %v4733_v39 = vrot.slane %v4716_v62, %v7930_v13  ;;  %v7579_v0 = vadd.f32 %v4770_v2, %v4758_v36  ;;  %v4717_v55 = vcombine.high %v4713_v19, %v4713_v19 }
 0x3e2   : > { %v7583_v3 = vadd.f32 %v4770_v2, %v4760_v28  ;;  %v7585_v56 = vadd.f32 %v4770_v2, %v4762_v30  ;;  %v4764_v9 = vmul.f32 %v4745_v20, %v7366_v49 }
 0x3e3   : > { %v7587_v58 = vadd.f32 %v4770_v2, %v4759_v18  ;;  %v4761_v7 = vmul.f32 %v4733_v39, %v4372_v24  ;;  %v4518_v5 = vpop.f32.mrb[42].mxu1  ;;  %v4788_v8 = vsel %vm2001_vm5, %v7579_v0, 0.0  ;;  %4780 = vst.msk [vmem:[%s7426_s19 + $0x8] sm:$0xf] %vm2001_vm5, %v7579_v0  ;;  %v4749_v42 = vrot.slane %v4717_v55, %v7930_v13  ;;  %v5662_v55 = vpop.permute.xlu0 %5661 }
 0x3e4   : > { %v4763_v10 = vmul.f32 %v4741_v33, %v4518_v5  ;;  %4789 = vadd.xlane.f32.xlu0 %v4788_v8  ;;  %v6555_v34 = vpop.f32.mrb[43].mxu1  ;;  %4782 = vst.msk [vmem:[%s7426_s19 + $0x28] sm:$0xf] %vm2001_vm5, %v7583_v3  ;;  %4784 = vst.msk [vmem:[%s7426_s19 + $0x48] sm:$0xf] %vm2001_vm5, %v7585_v56  ;;  %v7608_v49 = vadd.f32 %v4770_v2, %v4764_v9  ;;  %v4794_v57 = vsel %vm2001_vm5, %v7583_v3, 0.0 }
 0x3e5   : > { %4781 = vst.msk [vmem:[%s7426_s19 + $0x18] sm:$0xf] %vm2001_vm5, %v7587_v58  ;;  %v7604_v59 = vadd.f32 %v4770_v2, %v4761_v7  ;;  %v4791_v23 = vsel %vm2001_vm5, %v7587_v58, 0.0  ;;  %v4800_v54 = vsel %vm2001_vm5, %v7585_v56, 0.0 }
 0x3e6   : > { %v7610_v11 = vadd.f32 %v4770_v2, %v4763_v10  ;;  %4792 = vadd.xlane.f32.xlu1 %v4791_v23  ;;  %4786 = vst.msk [vmem:[%s7426_s19 + $0x68] sm:$0xf] %vm2001_vm5, %v7608_v49 }
 0x3e7   : > { %4783 = vst.msk [vmem:[%s7426_s19 + $0x38] sm:$0xf] %vm2001_vm5, %v7604_v59  ;;  %v4664_v38 = vpop.f32.mrb[44].mxu1  ;;  %v4797_v43 = vsel %vm2001_vm5, %v7604_v59, 0.0 }
 0x3e8   : > { %4785 = vst.msk [vmem:[%s7426_s19 + $0x58] sm:$0xf] %vm2001_vm5, %v7610_v11  ;;  %v4765_v44 = vmul.f32 %v4749_v42, %v4664_v38  ;;  %4795 = vadd.xlane.f32.xlu0 %v4794_v57  ;;  %v6565_v6 = vpop.f32.mrb[45].mxu1  ;;  %v4803_v28 = vsel %vm2001_vm5, %v7610_v11, 0.0 }
 0x3ea   : > { %v7626_v15 = vadd.f32 %v4770_v2, %v4765_v44  ;;  %4801 = vadd.xlane.f32.xlu1 %v4800_v54 }
 0x3eb   : > { %v4972_v22 = vpop.f32.mrb[46].mxu1 }
 0x3ec   : > { %4787 = vst.msk [vmem:[%s7426_s19 + $0x78] sm:$0xf] %vm2001_vm5, %v7626_v15  ;;  %v5561_v37 = vcombine.high %v4972_v22, %v4972_v22  ;;  %v5568_v21 = vrot.slane %v4972_v22, %v7929_v51  ;;  %v6575_v48 = vpop.f32.mrb[47].mxu1 }
 0x3ee   : > { %v5575_v53 = vrot.slane %v5561_v37, %v7929_v51  ;;  %v5576_v27 = vcombine.high %v5568_v21, %v5568_v21  ;;  %v5584_v19 = vrot.slane %v5568_v21, %v7929_v51  ;;  %4798 = vadd.xlane.f32.xlu1 %v4797_v43 }
 0x3ef   : > { %v5118_v32 = vpop.f32.mrb[48].mxu1 }
 0x3f0   : > { %v5577_v24 = vcombine.high %v5575_v53, %v5575_v53  ;;  %v5613_v62 = vrot.slane %v5584_v19, %v7930_v13  ;;  %v5606_v36 = vcombine.high %v5584_v19, %v5584_v19  ;;  %v5598_v2 = vrot.slane %v5576_v27, %v7929_v51  ;;  %v6585_v47 = vpop.f32.mrb[49].mxu1 }
 0x3f1   : > { %v5591_v30 = vrot.slane %v5575_v53, %v7929_v51 }
 0x3f2   : > { %v5650_v18 = vmul.f32 %v5613_v62, %v7402_v16  ;;  %4804 = vadd.xlane.f32.xlu1 %v4803_v28  ;;  %v5621_v39 = vrot.slane %v5606_v36, %v7930_v13  ;;  %v5617_v20 = vrot.slane %v5598_v2, %v7930_v13  ;;  %v5608_v33 = vcombine.high %v5598_v2, %v5598_v2 }
 0x3f3   : > { %v5629_v7 = vrot.slane %v5591_v30, %v7930_v13  ;;  %v5264_v5 = vpop.f32.mrb[50].mxu1  ;;  %v5607_v8 = vcombine.high %v5591_v30, %v5591_v30  ;;  %v5605_v9 = vrot.slane %v5577_v24, %v7929_v51  ;;  %v4806_v24 = vsel %vm2001_vm5, %v7608_v49, 0.0 }
 0x3f4   : > { %v7646_v10 = vadd.f32 %v5662_v55, %v5650_v18  ;;  %v5652_v34 = vmul.f32 %v5621_v39, %v7404_v14  ;;  %v5651_v23 = vmul.f32 %v5617_v20, %v5118_v32  ;;  %v5625_v16 = vrot.slane %v5608_v33, %v7930_v13  ;;  %v6595_v42 = vpop.f32.mrb[51].mxu1 }
 0x3f5   : > { %v5654_v38 = vmul.f32 %v5629_v7, %v7406_v26  ;;  %v5637_v57 = vrot.slane %v5607_v8, %v7930_v13  ;;  %v5633_v44 = vrot.slane %v5605_v9, %v7930_v13  ;;  %v5609_v6 = vcombine.high %v5605_v9, %v5605_v9 }
 0x3f6   : > { %5672 = vst.msk [vmem:[%s7426_s19 + $0xc] sm:$0xf] %vm2001_vm5, %v7646_v10  ;;  %v7656_v51 = vadd.f32 %v5662_v55, %v5652_v34  ;;  %v7658_v14 = vadd.f32 %v5662_v55, %v5651_v23  ;;  %v5653_v54 = vmul.f32 %v5625_v16, %v5264_v5  ;;  %v5680_v22 = vsel %vm2001_vm5, %v7646_v10, 0.0 }
 0x3f7   : > { %v7662_v37 = vadd.f32 %v5662_v55, %v5654_v38  ;;  %v5656_v26 = vmul.f32 %v5637_v57, %v7408_v29  ;;  %v5410_v21 = vpop.f32.mrb[52].mxu1  ;;  %5681 = vadd.xlane.f32.xlu1 %v5680_v22  ;;  %v5641_v32 = vrot.slane %v5609_v6, %v7930_v13  ;;  %v4809_v13 = vsel %vm2001_vm5, %v7626_v15, 0.0 }
 0x3f8   : > { %5674 = vst.msk [vmem:[%s7426_s19 + $0x2c] sm:$0xf] %vm2001_vm5, %v7656_v51  ;;  %5673 = vst.msk [vmem:[%s7426_s19 + $0x1c] sm:$0xf] %vm2001_vm5, %v7658_v14  ;;  %v7671_v48 = vadd.f32 %v5662_v55, %v5653_v54  ;;  %v5655_v43 = vmul.f32 %v5633_v44, %v5410_v21  ;;  %v5683_v53 = vsel %vm2001_vm5, %v7658_v14, 0.0  ;;  %v6605_v27 = vpop.f32.mrb[53].mxu1 }
 0x3f9   : > { %5676 = vst.msk [vmem:[%s7426_s19 + $0x4c] sm:$0xf] %vm2001_vm5, %v7662_v37  ;;  %v7678_v29 = vadd.f32 %v5662_v55, %v5656_v26  ;;  %5684 = vadd.xlane.f32.xlu0 %v5683_v53  ;;  %v5686_v2 = vsel %vm2001_vm5, %v7656_v51, 0.0  ;;  %v5692_v30 = vsel %vm2001_vm5, %v7662_v37, 0.0 }
 0x3fa   : > { %5675 = vst.msk [vmem:[%s7426_s19 + $0x3c] sm:$0xf] %vm2001_vm5, %v7671_v48  ;;  %v7683_v19 = vadd.f32 %v5662_v55, %v5655_v43  ;;  %v5689_v39 = vsel %vm2001_vm5, %v7671_v48, 0.0 }
 0x3fb   : > { %7931 = vst [vmem:[#allocation5_spill] sm:$0xff] %v7678_v29  ;;  %5678 = vst.msk [vmem:[%s7426_s19 + $0x6c] sm:$0xf] %vm2001_vm5, %v7678_v29  ;;  %v5556_v62 = vpop.f32.mrb[54].mxu1  ;;  %4807 = vadd.xlane.f32.xlu1 %v4806_v24  ;;  %v5698_v33 = vsel %vm2001_vm5, %v7678_v29, 0.0 }
 0x3fc   : > { %5677 = vst.msk [vmem:[%s7426_s19 + $0x5c] sm:$0xf] %vm2001_vm5, %v7683_v19  ;;  %v5657_v36 = vmul.f32 %v5641_v32, %v5556_v62  ;;  %v6615_v47 = vpop.f32.mrb[55].mxu1  ;;  %v5695_v20 = vsel %vm2001_vm5, %v7683_v19, 0.0 }
 0x3fd   : > { %5687 = vadd.xlane.f32.xlu0 %v5686_v2 }
 0x3fe   : > { %v7696_v28 = vadd.f32 %v5662_v55, %v5657_v36 }
 0x3ff   : > { %4810 = vadd.xlane.f32.xlu1 %v4809_v13 }
 0x400   : > { %7932 = vst [vmem:[#allocation3_spill] sm:$0xff] %v7696_v28  ;;  %5679 = vst.msk [vmem:[%s7426_s19 + $0x7c] sm:$0xf] %vm2001_vm5, %v7696_v28  ;;  %v5701_v18 = vsel %vm2001_vm5, %v7696_v28, 0.0 }
 0x401   : > { %5693 = vadd.xlane.f32.xlu0 %v5692_v30 }
 0x403   : > { %5702 = vadd.xlane.f32.xlu1 %v5701_v18 }
 0x405   : > { %5690 = vadd.xlane.f32.xlu0 %v5689_v39 }
 0x409   : > { %5696 = vadd.xlane.f32.xlu0 %v5695_v20 }
 0x40d   : > { %5699 = vadd.xlane.f32.xlu0 %v5698_v33 }
 0x449   : > { %v3005_v55 = vpop.xlane.xlu1 %3004 }
 0x44a   : > { %v3027_v13 = vsel %vm855_vm2, %v3005_v55, 0.0 }
 0x44b   : > { %v3008_v5 = vpop.xlane.xlu0 %3007 }
 0x44c   : > { %v3028_v36 = vsel %vm855_vm2, %v3008_v5, 0.0 }
 0x44d   : > { %v3014_v7 = vpop.xlane.xlu1 %3013  ;;  %v3029_v18 = vadd.f32 %v3028_v36, %v3027_v13 }
 0x44f   : > { %v3011_v9 = vpop.xlane.xlu0 %3010 }
 0x450   : > { %v3030_v30 = vsel %vm855_vm2, %v3011_v9, 0.0 }
 0x451   : > { %v3020_v8 = vpop.xlane.xlu1 %3019  ;;  %v3031_v29 = vadd.f32 %v3030_v30, %v3029_v18 }
 0x453   : > { %v3017_v23 = vpop.xlane.xlu0 %3016 }
 0x455   : > { %v7713_v34 = vpop.xlane.xlu1 %3025 }
 0x457   : > { %v3023_v42 = vpop.xlane.xlu0 %3022 }
 0x45d   : > { %v3897_v57 = vpop.xlane.xlu0 %3896 }
 0x45e   : > { %v3919_v24 = vsel %vm855_vm2, %v3897_v57, 0.0 }
 0x45f   : > { %v3900_v16 = vpop.xlane.xlu1 %3899 }
 0x460   : > { %v3920_v27 = vsel %vm855_vm2, %v3900_v16, 0.0 }
 0x461   : > { %v3903_v6 = vpop.xlane.xlu0 %3902  ;;  %v3921_v62 = vadd.f32 %v3920_v27, %v3919_v24 }
 0x462   : > { %v3922_v2 = vsel %vm855_vm2, %v3903_v6, 0.0  ;;  %v3032_v6 = vsel %vm855_vm2, %v3014_v7, 0.0 }
 0x463   : > { %v3906_v38 = vpop.xlane.xlu1 %3905  ;;  %v3923_v39 = vadd.f32 %v3922_v2, %v3921_v62  ;;  %v3033_v36 = vadd.f32 %v3032_v6, %v3031_v29  ;;  %v3034_v2 = vsel %vm855_vm2, %v3017_v23, 0.0  ;;  %v3036_v23 = vsel %vm855_vm2, %v3020_v8, 0.0 }
 0x464   : > { %v3924_v33 = vsel %vm855_vm2, %v3906_v38, 0.0  ;;  %v3038_v6 = vsel %vm855_vm2, %v3023_v42, 0.0 }
 0x465   : > { %v3909_v22 = vpop.xlane.xlu0 %3908  ;;  %v3925_v27 = vadd.f32 %v3924_v33, %v3923_v39  ;;  %v3035_v18 = vadd.f32 %v3034_v2, %v3033_v36 }
 0x466   : > { %v3926_v55 = vsel %vm855_vm2, %v3909_v22, 0.0 }
 0x467   : > { %v3912_v44 = vpop.xlane.xlu1 %3911 }
 0x468   : > { %v3928_v30 = vsel %vm855_vm2, %v3912_v44, 0.0 }
 0x469   : > { %v3915_v21 = vpop.xlane.xlu0 %3914 }
 0x46b   : > { %v3918_v54 = vpop.xlane.xlu1 %3917 }
 0x46c   : > { %v3932_v2 = vsel %vm855_vm2, %v3918_v54, 0.0 }
 0x471   : > { %v4790_v53 = vpop.xlane.xlu0 %4789 }
 0x472   : > { %v4812_v57 = vsel %vm855_vm2, %v4790_v53, 0.0 }
 0x473   : > { %v4793_v26 = vpop.xlane.xlu1 %4792 }
 0x474   : > { %v4813_v16 = vsel %vm855_vm2, %v4793_v26, 0.0  ;;  %v3927_v26 = vadd.f32 %v3926_v55, %v3925_v27  ;;  %v3037_v27 = vadd.f32 %v3036_v23, %v3035_v18  ;;  %v3040_v18 = vsel %vm855_vm2, %v7713_v34, 0.0 }
 0x475   : > { %v4796_v47 = vpop.xlane.xlu0 %4795  ;;  %v4814_v5 = vadd.f32 %v4813_v16, %v4812_v57 }
 0x476   : > { %v4815_v9 = vsel %vm855_vm2, %v4796_v47, 0.0  ;;  %v3929_v29 = vadd.f32 %v3928_v30, %v3927_v26 }
 0x477   : > { %v4802_v43 = vpop.xlane.xlu1 %4801  ;;  %v4816_v13 = vadd.f32 %v4815_v9, %v4814_v5 }
 0x478   : > { %v4819_v57 = vsel %vm855_vm2, %v4802_v43, 0.0  ;;  %v3039_v43 = vadd.f32 %v3038_v6, %v3037_v27 }
 0x47a   : > { %v3041_v54 = vadd.f32 %v3040_v18, %v3039_v43 }
 0x47b   : > { %v4799_v32 = vpop.xlane.xlu1 %4798 }
 0x47c   : > { %v4817_v38 = vsel %vm855_vm2, %v4799_v32, 0.0  ;;  %v3930_v32 = vsel %vm855_vm2, %v3915_v21, 0.0 }
 0x47d   : > { %v4818_v39 = vadd.f32 %v4817_v38, %v4816_v13  ;;  %v3931_v9 = vadd.f32 %v3930_v32, %v3929_v29 }
 0x47f   : > { %v4805_v20 = vpop.xlane.xlu1 %4804  ;;  %v4820_v44 = vadd.f32 %v4819_v57, %v4818_v39 }
 0x480   : > { %v4821_v55 = vsel %vm855_vm2, %v4805_v20, 0.0  ;;  %v3933_v20 = vadd.f32 %v3932_v2, %v3931_v9 }
 0x481   : > { %v4822_v38 = vadd.f32 %v4821_v55, %v4820_v44 }
 0x482   : > { %v3934_v29 = vadd.f32 %v3933_v20, %v3041_v54 }
 0x484   : > { %v5682_v24 = vpop.xlane.xlu1 %5681 }
 0x485   : > { %v5704_v22 = vsel %vm855_vm2, %v5682_v24, 0.0 }
 0x486   : > { %v5685_v28 = vpop.xlane.xlu0 %5684 }
 0x487   : > { %v5705_v53 = vsel %vm855_vm2, %v5685_v28, 0.0 }
 0x488   : > { %v4808_v33 = vpop.xlane.xlu1 %4807  ;;  %v5706_v16 = vadd.f32 %v5705_v53, %v5704_v22 }
 0x489   : > { %v4823_v8 = vsel %vm855_vm2, %v4808_v33, 0.0 }
 0x48a   : > { %v5688_v62 = vpop.xlane.xlu0 %5687  ;;  %v4824_v53 = vadd.f32 %v4823_v8, %v4822_v38 }
 0x48b   : > { %v5707_v47 = vsel %vm855_vm2, %v5688_v62, 0.0 }
 0x48c   : > { %v5708_v5 = vadd.f32 %v5707_v47, %v5706_v16  ;;  %v4811_v36 = vpop.xlane.xlu1 %4810 }
 0x48d   : > { %v4825_v30 = vsel %vm855_vm2, %v4811_v36, 0.0 }
 0x48e   : > { %v5694_v7 = vpop.xlane.xlu0 %5693  ;;  %v4826_v39 = vadd.f32 %v4825_v30, %v4824_v53 }
 0x48f   : > { %v5711_v21 = vsel %vm855_vm2, %v5694_v7, 0.0 }
 0x490   : > { %v5703_v33 = vpop.xlane.xlu1 %5702  ;;  %v4827_v32 = vadd.f32 %v4826_v39, %v3934_v29 }
 0x491   : > { %v5717_v23 = vsel %vm855_vm2, %v5703_v33, 0.0 }
 0x492   : > { %v5691_v28 = vpop.xlane.xlu0 %5690 }
 0x493   : > { %v5709_v24 = vsel %vm855_vm2, %v5691_v28, 0.0 }
 0x494   : > { %v5710_v62 = vadd.f32 %v5709_v24, %v5708_v5 }
 0x496   : > { %v5712_v26 = vadd.f32 %v5711_v21, %v5710_v62  ;;  %v5697_v13 = vpop.xlane.xlu0 %5696 }
 0x497   : > { %v5713_v42 = vsel %vm855_vm2, %v5697_v13, 0.0 }
 0x498   : > { %v5714_v22 = vadd.f32 %v5713_v42, %v5712_v26 }
 0x49a   : > { %v5700_v7 = vpop.xlane.xlu0 %5699 }
 0x49b   : > { %v5715_v47 = vsel %vm855_vm2, %v5700_v7, 0.0 }
 0x49c   : > { %v5716_v16 = vadd.f32 %v5715_v47, %v5714_v22 }
 0x49e   : > { %v5718_v57 = vadd.f32 %v5717_v23, %v5716_v16 }
 0x4a0   : > { %v5719_v27 = vadd.f32 %v5718_v57, %v4827_v32 }
 0x4a2   : > { %v7754_v34 = vmul.f32 0.00390625, %v5719_v27 }
 0x4a4   : > { %v5723_v44 = vsub.f32 %v7439_v41, %v7754_v34  ;;  %v5722_v5 = vsub.f32 %v7431_v46, %v7754_v34  ;;  %v5725_v28 = vsub.f32 %v7456_v25, %v7754_v34  ;;  %v5724_v6 = vsub.f32 %v7435_v17, %v7754_v34  ;;  %5946 = vst.msk [vmem:[%s533_s23] sm:$0xf] %vm5945_vm13, %v7754_v34 }
 0x4a5   : > { %v5727_v9 = vsub.f32 %v7462_v61, %v7754_v34  ;;  %v5726_v41 = vsub.f32 %v7437_v35, %v7754_v34  ;;  %v5729_v17 = vsub.f32 %v7478_v1, %v7754_v34  ;;  %v5728_v2 = vsub.f32 %v7460_v45, %v7754_v34 }
 0x4a6   : > { %v5731_v55 = vmul.f32 %v5723_v44, %v5723_v44  ;;  %v5730_v24 = vmul.f32 %v5722_v5, %v5722_v5  ;;  %v5733_v62 = vmul.f32 %v5725_v28, %v5725_v28  ;;  %v5732_v25 = vmul.f32 %v5724_v6, %v5724_v6 }
 0x4a7   : > { %v5735_v21 = vmul.f32 %v5727_v9, %v5727_v9  ;;  %v5734_v35 = vmul.f32 %v5726_v41, %v5726_v41  ;;  %v5737_v43 = vmul.f32 %v5729_v17, %v5729_v17  ;;  %v5736_v38 = vmul.f32 %v5728_v2, %v5728_v2 }
 0x4a8   : > { %v5741_v36 = vsel %vm2001_vm5, %v5731_v55, 0.0  ;;  %v5738_v46 = vsel %vm2001_vm5, %v5730_v24, 0.0  ;;  %v5747_v8 = vsel %vm2001_vm5, %v5733_v62, 0.0  ;;  %v5744_v61 = vsel %vm2001_vm5, %v5732_v25, 0.0 }
 0x4a9   : > { %5742 = vadd.xlane.f32.xlu1 %v5741_v36  ;;  %5739 = vadd.xlane.f32.xlu0 %v5738_v46  ;;  %v5753_v26 = vsel %vm2001_vm5, %v5735_v21, 0.0  ;;  %v5750_v13 = vsel %vm2001_vm5, %v5734_v35, 0.0  ;;  %v5778_v1 = vsub.f32 %v7513_v60, %v7754_v34  ;;  %v5777_v45 = vsub.f32 %v7505_v50, %v7754_v34 }
 0x4aa   : > { %v5759_v30 = vsel %vm2001_vm5, %v5737_v43, 0.0  ;;  %v5756_v42 = vsel %vm2001_vm5, %v5736_v38, 0.0  ;;  %v5780_v18 = vsub.f32 %v7530_v63, %v7754_v34  ;;  %v5779_v54 = vsub.f32 %v7509_v40, %v7754_v34 }
 0x4ab   : > { %v5786_v20 = vmul.f32 %v5778_v1, %v5778_v1  ;;  %v5785_v53 = vmul.f32 %v5777_v45, %v5777_v45  ;;  %v5782_v60 = vsub.f32 %v7536_v12, %v7754_v34  ;;  %v5781_v50 = vsub.f32 %v7511_v52, %v7754_v34 }
 0x4ac   : > { %v5788_v22 = vmul.f32 %v5780_v18, %v5780_v18  ;;  %v5787_v7 = vmul.f32 %v5779_v54, %v5779_v54  ;;  %v5784_v40 = vsub.f32 %v7552_v4, %v7754_v34  ;;  %v5783_v52 = vsub.f32 %v7534_v31, %v7754_v34  ;;  %v7934_v18 = vld [vmem:[#allocation5_spill] sm:$0xff] }
 0x4ad   : > { %5748 = vadd.xlane.f32.xlu1 %v5747_v8  ;;  %5745 = vadd.xlane.f32.xlu0 %v5744_v61  ;;  %v5796_v39 = vsel %vm2001_vm5, %v5786_v20, 0.0  ;;  %v5793_v33 = vsel %vm2001_vm5, %v5785_v53, 0.0  ;;  %v5790_v63 = vmul.f32 %v5782_v60, %v5782_v60  ;;  %v5789_v12 = vmul.f32 %v5781_v50, %v5781_v50 }
 0x4ae   : > { %v5802_v47 = vsel %vm2001_vm5, %v5788_v22, 0.0  ;;  %v5799_v29 = vsel %vm2001_vm5, %v5787_v7, 0.0  ;;  %v5792_v23 = vmul.f32 %v5784_v40, %v5784_v40  ;;  %v5791_v57 = vmul.f32 %v5783_v52, %v5783_v52 }
 0x4af   : > { %v5808_v16 = vsel %vm2001_vm5, %v5790_v63, 0.0  ;;  %v5805_v32 = vsel %vm2001_vm5, %v5789_v12, 0.0  ;;  %v5834_v27 = vsub.f32 %v7587_v58, %v7754_v34  ;;  %v5833_v4 = vsub.f32 %v7579_v0, %v7754_v34 }
 0x4b0   : > { %v5814_v44 = vsel %vm2001_vm5, %v5792_v23, 0.0  ;;  %v5836_v31 = vsub.f32 %v7604_v59, %v7754_v34  ;;  %v5811_v5 = vsel %vm2001_vm5, %v5791_v57, 0.0  ;;  %v5835_v55 = vsub.f32 %v7583_v3, %v7754_v34 }
 0x4b1   : > { %5754 = vadd.xlane.f32.xlu1 %v5753_v26  ;;  %5751 = vadd.xlane.f32.xlu0 %v5750_v13  ;;  %v5842_v28 = vmul.f32 %v5834_v27, %v5834_v27  ;;  %v5841_v6 = vmul.f32 %v5833_v4, %v5833_v4  ;;  %v5838_v58 = vsub.f32 %v7610_v11, %v7754_v34 }
 0x4b2   : > { %v5837_v0 = vsub.f32 %v7585_v56, %v7754_v34  ;;  %v5844_v59 = vmul.f32 %v5836_v31, %v5836_v31  ;;  %v5843_v41 = vmul.f32 %v5835_v55, %v5835_v55  ;;  %v5840_v3 = vsub.f32 %v7626_v15, %v7754_v34 }
 0x4b3   : > { %v5852_v24 = vsel %vm2001_vm5, %v5842_v28, 0.0  ;;  %v5849_v9 = vsel %vm2001_vm5, %v5841_v6, 0.0  ;;  %v5846_v36 = vmul.f32 %v5838_v58, %v5838_v58  ;;  %v5839_v56 = vsub.f32 %v7608_v49, %v7754_v34 }
 0x4b4   : > { %v5858_v46 = vsel %vm2001_vm5, %v5844_v59, 0.0  ;;  %v5855_v62 = vsel %vm2001_vm5, %v5843_v41, 0.0  ;;  %v5845_v11 = vmul.f32 %v5837_v0, %v5837_v0  ;;  %v5848_v17 = vmul.f32 %v5840_v3, %v5840_v3 }
 0x4b5   : > { %5760 = vadd.xlane.f32.xlu1 %v5759_v30  ;;  %5757 = vadd.xlane.f32.xlu0 %v5756_v42  ;;  %v5864_v25 = vsel %vm2001_vm5, %v5846_v36, 0.0  ;;  %v5847_v8 = vmul.f32 %v5839_v56, %v5839_v56  ;;  %v5890_v61 = vsub.f32 %v7658_v14, %v7754_v34  ;;  %v5889_v15 = vsub.f32 %v7646_v10, %v7754_v34  ;;  %v7933_v42 = vld [vmem:[#allocation3_spill] sm:$0xff] }
 0x4b6   : > { %v5861_v2 = vsel %vm2001_vm5, %v5845_v11, 0.0  ;;  %v5870_v21 = vsel %vm2001_vm5, %v5848_v17, 0.0  ;;  %v5892_v49 = vsub.f32 %v7671_v48, %v7754_v34  ;;  %v5891_v26 = vsub.f32 %v7656_v51, %v7754_v34 }
 0x4b7   : > { %v5867_v35 = vsel %vm2001_vm5, %v5847_v8, 0.0  ;;  %v5898_v43 = vmul.f32 %v5890_v61, %v5890_v61  ;;  %v5897_v38 = vmul.f32 %v5889_v15, %v5889_v15  ;;  %v5894_v14 = vsub.f32 %v7683_v19, %v7754_v34 }
 0x4b8   : > { %v5893_v10 = vsub.f32 %v7662_v37, %v7754_v34  ;;  %v5900_v48 = vmul.f32 %v5892_v49, %v5892_v49  ;;  %v5899_v45 = vmul.f32 %v5891_v26, %v5891_v26  ;;  %v5896_v51 = vsub.f32 %v7933_v42, %v7754_v34 }
 0x4b9   : > { %5797 = vadd.xlane.f32.xlu1 %v5796_v39  ;;  %5794 = vadd.xlane.f32.xlu0 %v5793_v33  ;;  %v5908_v13 = vsel %vm2001_vm5, %v5898_v43, 0.0  ;;  %v5905_v1 = vsel %vm2001_vm5, %v5897_v38, 0.0  ;;  %v5902_v30 = vmul.f32 %v5894_v14, %v5894_v14  ;;  %v5895_v37 = vsub.f32 %v7934_v18, %v7754_v34 }
 0x4ba   : > { %v5914_v20 = vsel %vm2001_vm5, %v5900_v48, 0.0  ;;  %v5911_v53 = vsel %vm2001_vm5, %v5899_v45, 0.0  ;;  %v5901_v19 = vmul.f32 %v5893_v10, %v5893_v10  ;;  %v5904_v50 = vmul.f32 %v5896_v51, %v5896_v51 }
 0x4bb   : > { %v5920_v54 = vsel %vm2001_vm5, %v5902_v30, 0.0  ;;  %v5903_v39 = vmul.f32 %v5895_v37, %v5895_v37 }
 0x4bc   : > { %v5917_v60 = vsel %vm2001_vm5, %v5901_v19, 0.0  ;;  %v5926_v33 = vsel %vm2001_vm5, %v5904_v50, 0.0 }
 0x4bd   : > { %5803 = vadd.xlane.f32.xlu1 %v5802_v47  ;;  %5800 = vadd.xlane.f32.xlu0 %v5799_v29  ;;  %v5923_v22 = vsel %vm2001_vm5, %v5903_v39, 0.0 }
 0x4c1   : > { %5809 = vadd.xlane.f32.xlu1 %v5808_v16  ;;  %5806 = vadd.xlane.f32.xlu0 %v5805_v32 }
 0x4c5   : > { %5815 = vadd.xlane.f32.xlu1 %v5814_v44  ;;  %5812 = vadd.xlane.f32.xlu0 %v5811_v5 }
 0x4c9   : > { %5853 = vadd.xlane.f32.xlu1 %v5852_v24  ;;  %5850 = vadd.xlane.f32.xlu0 %v5849_v9 }
 0x4cd   : > { %5859 = vadd.xlane.f32.xlu1 %v5858_v46  ;;  %5856 = vadd.xlane.f32.xlu0 %v5855_v62 }
 0x4d1   : > { %5865 = vadd.xlane.f32.xlu1 %v5864_v25  ;;  %5862 = vadd.xlane.f32.xlu0 %v5861_v2 }
 0x4d5   : > { %5871 = vadd.xlane.f32.xlu1 %v5870_v21  ;;  %5868 = vadd.xlane.f32.xlu0 %v5867_v35 }
 0x4d9   : > { %5909 = vadd.xlane.f32.xlu1 %v5908_v13  ;;  %5906 = vadd.xlane.f32.xlu0 %v5905_v1 }
 0x4dd   : > { %5915 = vadd.xlane.f32.xlu1 %v5914_v20  ;;  %5912 = vadd.xlane.f32.xlu0 %v5911_v53 }
 0x4e1   : > { %5921 = vadd.xlane.f32.xlu1 %v5920_v54  ;;  %5918 = vadd.xlane.f32.xlu0 %v5917_v60 }
 0x4e5   : > { %5927 = vadd.xlane.f32.xlu1 %v5926_v33  ;;  %5924 = vadd.xlane.f32.xlu0 %v5923_v22 }
 0x536   : > { %v5743_v7 = vpop.xlane.xlu1 %5742  ;;  %v5740_v63 = vpop.xlane.xlu0 %5739 }
 0x537   : > { %v5763_v58 = vsel %vm855_vm2, %v5743_v7, 0.0  ;;  %v5762_v0 = vsel %vm855_vm2, %v5740_v63, 0.0 }
 0x538   : > { %v5764_v11 = vadd.f32 %v5763_v58, %v5762_v0 }
 0x53a   : > { %v5749_v40 = vpop.xlane.xlu1 %5748  ;;  %v5746_v34 = vpop.xlane.xlu0 %5745 }
 0x53b   : > { %v5765_v46 = vsel %vm855_vm2, %v5746_v34, 0.0  ;;  %v5767_v49 = vsel %vm855_vm2, %v5749_v40, 0.0 }
 0x53c   : > { %v5766_v17 = vadd.f32 %v5765_v46, %v5764_v11 }
 0x53e   : > { %v5755_v47 = vpop.xlane.xlu1 %5754  ;;  %v5752_v29 = vpop.xlane.xlu0 %5751  ;;  %v5768_v38 = vadd.f32 %v5767_v49, %v5766_v17 }
 0x53f   : > { %v5769_v13 = vsel %vm855_vm2, %v5752_v29, 0.0  ;;  %v5771_v37 = vsel %vm855_vm2, %v5755_v47, 0.0 }
 0x540   : > { %v5770_v45 = vadd.f32 %v5769_v13, %v5768_v38 }
 0x542   : > { %v7854_v12 = vpop.xlane.xlu1 %5760  ;;  %v5758_v52 = vpop.xlane.xlu0 %5757  ;;  %v5772_v50 = vadd.f32 %v5771_v37, %v5770_v45 }
 0x543   : > { %v5773_v63 = vsel %vm855_vm2, %v5758_v52, 0.0 }
 0x544   : > { %v5774_v47 = vadd.f32 %v5773_v63, %v5772_v50 }
 0x546   : > { %v5798_v16 = vpop.xlane.xlu1 %5797  ;;  %v5795_v23 = vpop.xlane.xlu0 %5794 }
 0x547   : > { %v5818_v6 = vsel %vm855_vm2, %v5798_v16, 0.0  ;;  %v5817_v55 = vsel %vm855_vm2, %v5795_v23, 0.0 }
 0x548   : > { %v5819_v41 = vadd.f32 %v5818_v6, %v5817_v55  ;;  %v5775_v6 = vsel %vm855_vm2, %v7854_v12, 0.0 }
 0x549   : > { %v5776_v0 = vadd.f32 %v5775_v6, %v5774_v47 }
 0x54a   : > { %v5804_v32 = vpop.xlane.xlu1 %5803  ;;  %v5801_v57 = vpop.xlane.xlu0 %5800 }
 0x54b   : > { %v5820_v24 = vsel %vm855_vm2, %v5801_v57, 0.0  ;;  %v5822_v15 = vsel %vm855_vm2, %v5804_v32, 0.0 }
 0x54c   : > { %v5821_v56 = vadd.f32 %v5820_v24, %v5819_v41 }
 0x54e   : > { %v5810_v27 = vpop.xlane.xlu1 %5809  ;;  %v5807_v4 = vpop.xlane.xlu0 %5806  ;;  %v5823_v21 = vadd.f32 %v5822_v15, %v5821_v56 }
 0x54f   : > { %v5824_v35 = vsel %vm855_vm2, %v5807_v4, 0.0  ;;  %v5826_v20 = vsel %vm855_vm2, %v5810_v27, 0.0 }
 0x550   : > { %v5825_v48 = vadd.f32 %v5824_v35, %v5823_v21 }
 0x552   : > { %v5816_v44 = vpop.xlane.xlu1 %5815  ;;  %v5813_v31 = vpop.xlane.xlu0 %5812  ;;  %v5827_v18 = vadd.f32 %v5826_v20, %v5825_v48 }
 0x553   : > { %v5828_v54 = vsel %vm855_vm2, %v5813_v31, 0.0  ;;  %v5830_v31 = vsel %vm855_vm2, %v5816_v44, 0.0 }
 0x554   : > { %v5829_v29 = vadd.f32 %v5828_v54, %v5827_v18 }
 0x556   : > { %v5854_v5 = vpop.xlane.xlu1 %5853  ;;  %v5851_v28 = vpop.xlane.xlu0 %5850 }
 0x557   : > { %v5874_v9 = vsel %vm855_vm2, %v5854_v5, 0.0  ;;  %v5873_v59 = vsel %vm855_vm2, %v5851_v28, 0.0  ;;  %v5831_v28 = vadd.f32 %v5830_v31, %v5829_v29 }
 0x558   : > { %v5875_v25 = vadd.f32 %v5874_v9, %v5873_v59 }
 0x559   : > { %v5832_v44 = vadd.f32 %v5831_v28, %v5776_v0 }
 0x55a   : > { %v5860_v36 = vpop.xlane.xlu1 %5859  ;;  %v5857_v3 = vpop.xlane.xlu0 %5856 }
 0x55b   : > { %v5876_v62 = vsel %vm855_vm2, %v5857_v3, 0.0  ;;  %v5878_v43 = vsel %vm855_vm2, %v5860_v36, 0.0 }
 0x55c   : > { %v5877_v2 = vadd.f32 %v5876_v62, %v5875_v25 }
 0x55e   : > { %v5866_v8 = vpop.xlane.xlu1 %5865  ;;  %v5863_v61 = vpop.xlane.xlu0 %5862  ;;  %v5879_v26 = vadd.f32 %v5878_v43, %v5877_v2 }
 0x55f   : > { %v5880_v1 = vsel %vm855_vm2, %v5863_v61, 0.0  ;;  %v5882_v60 = vsel %vm855_vm2, %v5866_v8, 0.0 }
 0x560   : > { %v5881_v30 = vadd.f32 %v5880_v1, %v5879_v26 }
 0x562   : > { %v5872_v14 = vpop.xlane.xlu1 %5871  ;;  %v5869_v10 = vpop.xlane.xlu0 %5868  ;;  %v5883_v39 = vadd.f32 %v5882_v60, %v5881_v30 }
 0x563   : > { %v5884_v40 = vsel %vm855_vm2, %v5869_v10, 0.0  ;;  %v5886_v55 = vsel %vm855_vm2, %v5872_v14, 0.0 }
 0x564   : > { %v5885_v32 = vadd.f32 %v5884_v40, %v5883_v39 }
 0x566   : > { %v5910_v42 = vpop.xlane.xlu1 %5909  ;;  %v5907_v51 = vpop.xlane.xlu0 %5906  ;;  %v5887_v24 = vadd.f32 %v5886_v55, %v5885_v32 }
 0x567   : > { %v5930_v53 = vsel %vm855_vm2, %v5910_v42, 0.0  ;;  %v5929_v19 = vsel %vm855_vm2, %v5907_v51, 0.0 }
 0x568   : > { %v5931_v33 = vadd.f32 %v5930_v53, %v5929_v19  ;;  %v5888_v62 = vadd.f32 %v5887_v24, %v5832_v44 }
 0x56a   : > { %v5916_v22 = vpop.xlane.xlu1 %5915  ;;  %v5913_v7 = vpop.xlane.xlu0 %5912 }
 0x56b   : > { %v5932_v34 = vsel %vm855_vm2, %v5913_v7, 0.0  ;;  %v5934_v23 = vsel %vm855_vm2, %v5916_v22, 0.0 }
 0x56c   : > { %v5933_v16 = vadd.f32 %v5932_v34, %v5931_v33 }
 0x56e   : > { %v5922_v57 = vpop.xlane.xlu1 %5921  ;;  %v5935_v27 = vadd.f32 %v5934_v23, %v5933_v16  ;;  %v5919_v4 = vpop.xlane.xlu0 %5918 }
 0x56f   : > { %v5936_v5 = vsel %vm855_vm2, %v5919_v4, 0.0  ;;  %v5938_v58 = vsel %vm855_vm2, %v5922_v57, 0.0 }
 0x570   : > { %v5937_v52 = vadd.f32 %v5936_v5, %v5935_v27 }
 0x572   : > { %v5928_v9 = vpop.xlane.xlu1 %5927  ;;  %v5939_v59 = vadd.f32 %v5938_v58, %v5937_v52  ;;  %v5925_v41 = vpop.xlane.xlu0 %5924 }
 0x573   : > { %v5940_v36 = vsel %vm855_vm2, %v5925_v41, 0.0  ;;  %v5942_v46 = vsel %vm855_vm2, %v5928_v9, 0.0 }
 0x574   : > { %v5941_v3 = vadd.f32 %v5940_v36, %v5939_v59 }
 0x576   : > { %v5943_v11 = vadd.f32 %v5942_v46, %v5941_v3 }
 0x578   : > { %v5944_v12 = vadd.f32 %v5943_v11, %v5888_v62 }
 0x57a   : > { %5947 = vst.msk [vmem:[%s537_s26] sm:$0xf] %vm5945_vm13, %v5944_v12 }
 0x57b PF: > { %s28_s20 = sadd.s32 1, %s6720_s20  }
 0x57c   : > { %p25_p4 = scmp.ge.s32.totalorder %s28_s20, 4  }
 0x57e   :  { %27 = sbr.rel (!%p25_p4) target bundleno = 3 (0x3), region = 131 }

</bundles_post_ra>
